<compile_context>
chip_gen: v6e
topology: v6e:2x2x1
jax: 0.10.0
libtpu: 0.0.40
codegen_flags: <defaults>
</compile_context>

<pallas_src>
import functools
import math

import jax
import jax.numpy as jnp
from jax.experimental import pallas as pl
from jax.experimental.pallas import tpu as pltpu

ROW_TILE = 512        # token-axis tile (multiple of 8) for QKV / FFN kernels
Q_TILE = 256          # query-axis tile for the attention kernel
NEG_INF = -1e9
LN_EPS = 1e-5


def _tile(n, target):
    # Whole array if small (block == full dim is always legal), else a fixed
    # multiple-of-8 tile; Pallas handles the final partial block.
    return n if n <= target else target


def _mosaic_params(num_axes, vmem_mb):
    return pltpu.CompilerParams(
        dimension_semantics=("parallel",) * num_axes,
        vmem_limit_bytes=vmem_mb * 1024 * 1024,
    )


# --------------------- kernel 1: (x [+ pos]) -> q, k, v ---------------------

def _qkv_kernel(*refs, has_pos):
    it = iter(refs)
    x_ref = next(it)
    pos_ref = next(it) if has_pos else None
    wqk_ref, bqk_ref, wv_ref, bv_ref = next(it), next(it), next(it), next(it)
    q_ref, k_ref, v_ref = next(it), next(it), next(it)

    d = q_ref.shape[-1]
    x = x_ref[...]
    xqk = x if pos_ref is None else x + pos_ref[...]   # fused pos-embed add
    qk = jnp.dot(xqk, wqk_ref[...],
                 preferred_element_type=jnp.float32) + bqk_ref[...]
    q_ref[...] = qk[:, :d].astype(q_ref.dtype)
    k_ref[...] = qk[:, d:].astype(k_ref.dtype)
    v_ref[...] = (jnp.dot(x, wv_ref[...], preferred_element_type=jnp.float32)
                  + bv_ref[...]).astype(v_ref.dtype)


def qkv_proj_pallas(x, pos, w_qk, b_qk, w_v, b_v):
    """x, pos: (N, D) (pos may be None). Returns q, k, v each (N, D)."""
    n, d = x.shape
    d2 = w_qk.shape[1]
    tn = _tile(n, ROW_TILE)
    row = pl.BlockSpec((tn, d), lambda i: (i, 0))
    has_pos = pos is not None

    in_specs = [row] + ([row] if has_pos else []) + [
        pl.BlockSpec((d, d2), lambda i: (0, 0)),
        pl.BlockSpec((1, d2), lambda i: (0, 0)),
        pl.BlockSpec((d, d), lambda i: (0, 0)),
        pl.BlockSpec((1, d), lambda i: (0, 0)),
    ]
    args = [x] + ([pos] if has_pos else []) + [
        w_qk, b_qk.reshape(1, d2), w_v, b_v.reshape(1, d)]

    return pl.pallas_call(
        functools.partial(_qkv_kernel, has_pos=has_pos),
        out_shape=(jax.ShapeDtypeStruct((n, d), x.dtype),) * 3,
        grid=(pl.cdiv(n, tn),),
        in_specs=in_specs,
        out_specs=(row, row, row),
        compiler_params=_mosaic_params(1, 32),
    )(*args)


# ---- kernel 2: MHA (query-tiled) + out-proj + residual + LayerNorm ---------

def _mha_oln_kernel(*refs, nhead, scale, eps, has_kp, has_am):
    it = iter(refs)
    q_ref, k_ref, v_ref = next(it), next(it), next(it)
    kp_ref = next(it) if has_kp else None
    am_ref = next(it) if has_am else None
    x_ref = next(it)                       # residual (pre-attention src)
    wo_ref, bo_ref = next(it), next(it)
    g_ref, b_ref = next(it), next(it)
    o_ref = next(it)
    attn_sc = next(it)                     # (g, TQ, D) f32 VMEM scratch

    d = q_ref.shape[-1]
    dh = d // nhead
    q = q_ref[...].astype(jnp.float32) * scale
    k = k_ref[...].astype(jnp.float32)
    v = v_ref[...].astype(jnp.float32)

    # Per-(batch-group, query-tile) additive bias: at most (g, TQ, S).
    bias = None
    if has_kp:
        bias = kp_ref[...].astype(jnp.float32)               # (g, 1, S)
    if has_am:
        am = am_ref[...].astype(jnp.float32)[None, :, :]      # (1, TQ, S)
        bias = am if bias is None else bias + am

    for h in range(nhead):                 # static head slices; each head's
        lo = h * dh                        # score/p slab is consumed (stored)
        s = jnp.einsum('bqd,bkd->bqk',     # before the next head starts
                       q[:, :, lo:lo + dh], k[:, :, lo:lo + dh],
                       preferred_element_type=jnp.float32)
        if bias is not None:
            s = s + bias
        m = jnp.max(s, axis=-1, keepdims=True)
        p = jnp.exp(s - m)
        p = p / jnp.sum(p, axis=-1, keepdims=True)   # exact (PyTorch parity)
        attn_sc[:, :, lo:lo + dh] = jnp.einsum(
            'bqk,bkd->bqd', p, v[:, :, lo:lo + dh],
            preferred_element_type=jnp.float32)

    # Fused out-projection (single full-K matmul) + residual + LayerNorm,
    # single lane-dense full-width store.
    gdim, tq, _ = attn_sc.shape
    y = jnp.dot(attn_sc[...].reshape(gdim * tq, d), wo_ref[...],
                preferred_element_type=jnp.float32).reshape(gdim, tq, d)
    y = y + bo_ref[...].astype(jnp.float32) + x_ref[...].astype(jnp.float32)
    mu = jnp.mean(y, axis=-1, keepdims=True)
    var = jnp.mean(jnp.square(y - mu), axis=-1, keepdims=True)
    o_ref[...] = ((y - mu) * jax.lax.rsqrt(var + eps)
                  * g_ref[...] + b_ref[...]).astype(o_ref.dtype)


def mha_oproj_ln_pallas(q, k, v, x_res, kp_bias, attn_bias, w_o, b_o,
                        gamma, beta, nhead, *, batch_group=1, eps=LN_EPS):
    """q/k/v/x_res: (B, S, D); kp_bias: (B, S) additive or None;
    attn_bias: (S, S) additive or None.  Returns norm1(x + out_proj(mha))."""
    b, s, d = q.shape
    dh = d // nhead
    g = min(b, batch_group)
    tq = _tile(s, Q_TILE)
    grid = (pl.cdiv(b, g), pl.cdiv(s, tq))

    qblk = pl.BlockSpec((g, tq, d), lambda bi, qi: (bi, qi, 0))
    kvblk = pl.BlockSpec((g, s, d), lambda bi, qi: (bi, 0, 0))
    vec = pl.BlockSpec((1, d), lambda bi, qi: (0, 0))

    has_kp = kp_bias is not None
    has_am = attn_bias is not None
    in_specs = [qblk, kvblk, kvblk]
    args = [q, k, v]
    if has_kp:   # (B,1,S) so the block's last two dims are full dims (legal)
        in_specs.append(pl.BlockSpec((g, 1, s), lambda bi, qi: (bi, 0, 0)))
        args.append(kp_bias.reshape(b, 1, s))
    if has_am:
        in_specs.append(pl.BlockSpec((tq, s), lambda bi, qi: (qi, 0)))
        args.append(attn_bias)
    in_specs += [qblk, pl.BlockSpec((d, d), lambda bi, qi: (0, 0)),
                 vec, vec, vec]
    args += [x_res, w_o, b_o.reshape(1, d),
             gamma.reshape(1, d), beta.reshape(1, d)]

    return pl.pallas_call(
        functools.partial(_mha_oln_kernel, nhead=nhead,
                          scale=1.0 / math.sqrt(dh), eps=eps,
                          has_kp=has_kp, has_am=has_am),
        out_shape=jax.ShapeDtypeStruct((b, s, d), q.dtype),
        grid=grid,
        in_specs=in_specs,
        out_specs=qblk,
        scratch_shapes=[pltpu.VMEM((g, tq, d), jnp.float32)],
        compiler_params=_mosaic_params(2, 48),
    )(*args)


# --------------- kernel 3: FFN + residual-add + LayerNorm -------------------

def _ffn_add_ln_kernel(x_ref, w1_ref, b1_ref, w2_ref, b2_ref, g_ref, b_ref,
                       o_ref, *, eps):
    """LayerNorm(x + linear2(relu(linear1(x))))."""
    x = x_ref[...]
    h = jnp.dot(x, w1_ref[...], preferred_element_type=jnp.float32) + b1_ref[...]
    h = jnp.maximum(h, 0.0)                       # relu, kept f32 for matmul 2
    y = jnp.dot(h, w2_ref[...], preferred_element_type=jnp.float32) + b2_ref[...]
    y = y + x.astype(jnp.float32)
    mu = jnp.mean(y, axis=-1, keepdims=True)
    var = jnp.mean(jnp.square(y - mu), axis=-1, keepdims=True)
    o_ref[...] = ((y - mu) * jax.lax.rsqrt(var + eps)
                  * g_ref[...] + b_ref[...]).astype(o_ref.dtype)


def ffn_add_ln_pallas(x, w1, b1, w2, b2, gamma, beta, eps=LN_EPS):
    n, d = x.shape
    f = w1.shape[1]
    tn = _tile(n, ROW_TILE)
    row = pl.BlockSpec((tn, d), lambda i: (i, 0))
    vec_d = pl.BlockSpec((1, d), lambda i: (0, 0))
    return pl.pallas_call(
        functools.partial(_ffn_add_ln_kernel, eps=eps),
        out_shape=jax.ShapeDtypeStruct((n, d), x.dtype),
        grid=(pl.cdiv(n, tn),),
        in_specs=[
            row,
            pl.BlockSpec((d, f), lambda i: (0, 0)),
            pl.BlockSpec((1, f), lambda i: (0, 0)),
            pl.BlockSpec((f, d), lambda i: (0, 0)),
            vec_d, vec_d, vec_d,
        ],
        out_specs=row,
        compiler_params=_mosaic_params(1, 40),
    )(x, w1, b1.reshape(1, f), w2, b2.reshape(1, d),
      gamma.reshape(1, d), beta.reshape(1, d))


# ------------------------- encoder layer (forward_post) ---------------------

def encoder_layer_forward(params, src, src_mask=None, src_key_padding_mask=None,
                          pos=None, *, nhead):
    """PyTorch TransformerEncoderLayer.forward with normalize_before=False,
    activation='relu', dropout treated as inference-mode identity.
    src/pos: (S, B, D); src_key_padding_mask: (B, S) bool; src_mask: (S, S)."""
    s_len, bsz, d = src.shape
    # Batch-first layout: attention gets contiguous per-batch blocks without
    # per-head host transposes; token-wise kernels are layout-agnostic.
    x = jnp.transpose(src, (1, 0, 2))
    pos_b = None if pos is None else jnp.transpose(pos, (1, 0, 2))
    n = bsz * s_len

    q, k, v = qkv_proj_pallas(
        x.reshape(n, d), None if pos_b is None else pos_b.reshape(n, d),
        params["w_qk"], params["b_qk"], params["w_v"], params["b_v"])
    q = q.reshape(bsz, s_len, d)
    k = k.reshape(bsz, s_len, d)
    v = v.reshape(bsz, s_len, d)

    # No-mask specialization: bias inputs are simply omitted when masks are
    # None (no zero-tensor DMA into the attention kernel).
    kp_bias = None
    if src_key_padding_mask is not None:
        kp_bias = jnp.where(src_key_padding_mask, NEG_INF, 0.0).astype(jnp.float32)
    if src_mask is None:
        attn_bias = None
    elif src_mask.dtype == jnp.bool_:
        attn_bias = jnp.where(src_mask, NEG_INF, 0.0).astype(jnp.float32)
    else:
        attn_bias = src_mask.astype(jnp.float32)

    # src = norm1(src + out_proj(self_attn(...)))   -- one fused kernel
    y1 = mha_oproj_ln_pallas(q, k, v, x, kp_bias, attn_bias,
                             params["w_o"], params["b_o"],
                             params["ln1_g"], params["ln1_b"], nhead)

    # src = norm2(src + linear2(relu(linear1(src))))   -- one fused kernel
    y2 = ffn_add_ln_pallas(y1.reshape(n, d), params["w_1"], params["b_1"],
                           params["w_2"], params["b_2"],
                           params["ln2_g"], params["ln2_b"])
    return jnp.transpose(y2.reshape(bsz, s_len, d), (1, 0, 2))


# ----------------------------- parameter init ------------------------------

def _xavier(key, shape):
    fan_in, fan_out = shape
    a = (6.0 / (fan_in + fan_out)) ** 0.5
    return jax.random.uniform(key, shape, jnp.float32, -a, a)


def init_encoder_layer(key, d_model, dff):
    ks = jax.random.split(key, 6)
    wq = _xavier(ks[0], (d_model, d_model))
    wk = _xavier(ks[1], (d_model, d_model))
    z = jnp.zeros((d_model,), jnp.float32)
    return {
        "w_qk": jnp.concatenate([wq, wk], axis=1),     # fused q|k projection
        "b_qk": jnp.zeros((2 * d_model,), jnp.float32),
        "w_v": _xavier(ks[2], (d_model, d_model)), "b_v": z,
        "w_o": _xavier(ks[3], (d_model, d_model)), "b_o": z,
        "w_1": _xavier(ks[4], (d_model, dff)),
        "b_1": jnp.zeros((dff,), jnp.float32),
        "w_2": _xavier(ks[5], (dff, d_model)),
        "b_2": z,
        "ln1_g": jnp.ones((d_model,), jnp.float32), "ln1_b": z,
        "ln2_g": jnp.ones((d_model,), jnp.float32), "ln2_b": z,
    }


# --------------------------------- main -------------------------------------

if __name__ == "__main__":
    d_model, nhead, dff = 32, 4, 64
    seq_len, batch = 16, 2

    key = jax.random.PRNGKey(0)
    kp, ksrc, kpos = jax.random.split(key, 3)
    params = init_encoder_layer(kp, d_model, dff)

    src = jax.random.normal(ksrc, (seq_len, batch, d_model), jnp.float32)
    pos = jax.random.normal(kpos, (seq_len, batch, d_model), jnp.float32)
    # mark the last 3 positions of batch 0 as padding to exercise the mask path
    key_padding_mask = jnp.zeros((batch, seq_len), dtype=bool).at[0, -3:].set(True)

    # TODO(synk): dropout/dropout1/dropout2 are inference-mode identity; only
    # the default relu activation and forward_post (normalize_before=False)
    # paths are implemented (no gelu/glu, no forward_pre).
    fwd = jax.jit(functools.partial(encoder_layer_forward, nhead=nhead))
    out = fwd(params, src, None, key_padding_mask, pos)
    jax.block_until_ready(out)

    assert out.shape == (seq_len, batch, d_model)
    assert bool(jnp.all(jnp.isfinite(out)))
    print("KERNEL_OK")
</pallas_src>

<mosaic_0001>
module attributes {stable_mosaic.version = 11 : i64} {
  func.func @_qkv_kernel(%arg0: i32, %arg1: memref<32x32xf32, #tpu.memory_space<vmem>>, %arg2: memref<32x32xf32, #tpu.memory_space<vmem>>, %arg3: memref<32x64xf32, #tpu.memory_space<vmem>>, %arg4: memref<1x64xf32, #tpu.memory_space<vmem>>, %arg5: memref<32x32xf32, #tpu.memory_space<vmem>>, %arg6: memref<1x32xf32, #tpu.memory_space<vmem>>, %arg7: memref<32x32xf32, #tpu.memory_space<vmem>>, %arg8: memref<32x32xf32, #tpu.memory_space<vmem>>, %arg9: memref<32x32xf32, #tpu.memory_space<vmem>>) attributes {dimension_semantics = [#tpu.dimension_semantics<parallel>], iteration_bounds = array<i64: 1>, scalar_prefetch = 0 : i64, scratch_operands = 0 : i64, tpu.core_type = #tpu.core_type<tc>, window_params = [{transform_indices = @transform_0, window_bounds = array<i64: 32, 32>}, {transform_indices = @transform_1, window_bounds = array<i64: 32, 32>}, {pipeline_mode = #tpu.pipeline_mode<synchronous>, transform_indices = @transform_2, window_bounds = array<i64: 32, 64>}, {pipeline_mode = #tpu.pipeline_mode<synchronous>, transform_indices = @transform_3, window_bounds = array<i64: 1, 64>}, {pipeline_mode = #tpu.pipeline_mode<synchronous>, transform_indices = @transform_4, window_bounds = array<i64: 32, 32>}, {pipeline_mode = #tpu.pipeline_mode<synchronous>, transform_indices = @transform_5, window_bounds = array<i64: 1, 32>}, {transform_indices = @transform_6, window_bounds = array<i64: 32, 32>}, {transform_indices = @transform_7, window_bounds = array<i64: 32, 32>}, {transform_indices = @transform_8, window_bounds = array<i64: 32, 32>}]} {
    %c0 = arith.constant 0 : index
    %c0_0 = arith.constant 0 : index
    %0 = vector.load %arg1[%c0, %c0_0] : memref<32x32xf32, #tpu.memory_space<vmem>>, vector<32x32xf32>
    %c0_1 = arith.constant 0 : index
    %c0_2 = arith.constant 0 : index
    %1 = vector.load %arg2[%c0_1, %c0_2] : memref<32x32xf32, #tpu.memory_space<vmem>>, vector<32x32xf32>
    %2 = arith.addf %0, %1 : vector<32x32xf32>
    %c0_3 = arith.constant 0 : index
    %c0_4 = arith.constant 0 : index
    %3 = vector.load %arg3[%c0_3, %c0_4] : memref<32x64xf32, #tpu.memory_space<vmem>>, vector<32x64xf32>
    %cst = arith.constant dense<0.000000e+00> : vector<32x64xf32>
    %4 = tpu.matmul %2, %3, %cst {dimension_numbers = #tpu.dot_dimension_numbers<[1], [0], [0], [1], [0, 0, 1, 1], [], []>} : vector<32x32xf32>, vector<32x64xf32>, vector<32x64xf32> -> vector<32x64xf32>
    %c0_5 = arith.constant 0 : index
    %c0_6 = arith.constant 0 : index
    %5 = vector.load %arg4[%c0_5, %c0_6] : memref<1x64xf32, #tpu.memory_space<vmem>>, vector<1x64xf32>
    %6 = vector.broadcast %5 : vector<1x64xf32> to vector<32x64xf32>
    %7 = arith.addf %4, %6 : vector<32x64xf32>
    %8 = vector.extract_strided_slice %7 {offsets = [0, 0], sizes = [32, 32], strides = [1, 1]} : vector<32x64xf32> to vector<32x32xf32>
    %c0_7 = arith.constant 0 : index
    %c0_8 = arith.constant 0 : index
    %9 = vector.load %arg7[%c0_7, %c0_8] : memref<32x32xf32, #tpu.memory_space<vmem>>, vector<32x32xf32>
    tpu.vector_store %arg7[%c0_7, %c0_8], %8 {strides = array<i32>} : memref<32x32xf32, #tpu.memory_space<vmem>>, vector<32x32xf32>,
    %10 = vector.extract_strided_slice %7 {offsets = [0, 32], sizes = [32, 32], strides = [1, 1]} : vector<32x64xf32> to vector<32x32xf32>
    %c0_9 = arith.constant 0 : index
    %c0_10 = arith.constant 0 : index
    %11 = vector.load %arg8[%c0_9, %c0_10] : memref<32x32xf32, #tpu.memory_space<vmem>>, vector<32x32xf32>
    tpu.vector_store %arg8[%c0_9, %c0_10], %10 {strides = array<i32>} : memref<32x32xf32, #tpu.memory_space<vmem>>, vector<32x32xf32>,
    %c0_11 = arith.constant 0 : index
    %c0_12 = arith.constant 0 : index
    %12 = vector.load %arg5[%c0_11, %c0_12] : memref<32x32xf32, #tpu.memory_space<vmem>>, vector<32x32xf32>
    %cst_13 = arith.constant dense<0.000000e+00> : vector<32x32xf32>
    %13 = tpu.matmul %0, %12, %cst_13 {dimension_numbers = #tpu.dot_dimension_numbers<[1], [0], [0], [1], [0, 0, 1, 1], [], []>} : vector<32x32xf32>, vector<32x32xf32>, vector<32x32xf32> -> vector<32x32xf32>
    %c0_14 = arith.constant 0 : index
    %c0_15 = arith.constant 0 : index
    %14 = vector.load %arg6[%c0_14, %c0_15] : memref<1x32xf32, #tpu.memory_space<vmem>>, vector<1x32xf32>
    %15 = vector.broadcast %14 : vector<1x32xf32> to vector<32x32xf32>
    %16 = arith.addf %13, %15 : vector<32x32xf32>
    %c0_16 = arith.constant 0 : index
    %c0_17 = arith.constant 0 : index
    %17 = vector.load %arg9[%c0_16, %c0_17] : memref<32x32xf32, #tpu.memory_space<vmem>>, vector<32x32xf32>
    tpu.vector_store %arg9[%c0_16, %c0_17], %16 {strides = array<i32>} : memref<32x32xf32, #tpu.memory_space<vmem>>, vector<32x32xf32>,
    return
  }
  func.func @transform_0(%arg0: i32) -> (i32, i32) {
    %c0_i32 = arith.constant 0 : i32
    %c0_i32_0 = arith.constant 0 : i32
    return %arg0, %c0_i32 : i32, i32
  }
  func.func @transform_1(%arg0: i32) -> (i32, i32) {
    %c0_i32 = arith.constant 0 : i32
    %c0_i32_0 = arith.constant 0 : i32
    return %arg0, %c0_i32 : i32, i32
  }
  func.func @transform_2(%arg0: i32) -> (i32, i32) {
    %c0_i32 = arith.constant 0 : i32
    %c0_i32_0 = arith.constant 0 : i32
    %c0_i32_1 = arith.constant 0 : i32
    return %c0_i32, %c0_i32_0 : i32, i32
  }
  func.func @transform_3(%arg0: i32) -> (i32, i32) {
    %c0_i32 = arith.constant 0 : i32
    %c0_i32_0 = arith.constant 0 : i32
    %c0_i32_1 = arith.constant 0 : i32
    return %c0_i32, %c0_i32_0 : i32, i32
  }
  func.func @transform_4(%arg0: i32) -> (i32, i32) {
    %c0_i32 = arith.constant 0 : i32
    %c0_i32_0 = arith.constant 0 : i32
    %c0_i32_1 = arith.constant 0 : i32
    return %c0_i32, %c0_i32_0 : i32, i32
  }
  func.func @transform_5(%arg0: i32) -> (i32, i32) {
    %c0_i32 = arith.constant 0 : i32
    %c0_i32_0 = arith.constant 0 : i32
    %c0_i32_1 = arith.constant 0 : i32
    return %c0_i32, %c0_i32_0 : i32, i32
  }
  func.func @transform_6(%arg0: i32) -> (i32, i32) {
    %c0_i32 = arith.constant 0 : i32
    %c0_i32_0 = arith.constant 0 : i32
    return %arg0, %c0_i32 : i32, i32
  }
  func.func @transform_7(%arg0: i32) -> (i32, i32) {
    %c0_i32 = arith.constant 0 : i32
    %c0_i32_0 = arith.constant 0 : i32
    return %arg0, %c0_i32 : i32, i32
  }
  func.func @transform_8(%arg0: i32) -> (i32, i32) {
    %c0_i32 = arith.constant 0 : i32
    %c0_i32_0 = arith.constant 0 : i32
    return %arg0, %c0_i32 : i32, i32
  }
}

module attributes {stable_mosaic.version = 11 : i64} {
  func.func @_mha_oln_kernel(%arg0: i32, %arg1: i32, %arg2: memref<1x16x32xf32, #tpu.memory_space<vmem>>, %arg3: memref<1x16x32xf32, #tpu.memory_space<vmem>>, %arg4: memref<1x16x32xf32, #tpu.memory_space<vmem>>, %arg5: memref<1x1x16xf32, #tpu.memory_space<vmem>>, %arg6: memref<1x16x32xf32, #tpu.memory_space<vmem>>, %arg7: memref<32x32xf32, #tpu.memory_space<vmem>>, %arg8: memref<1x32xf32, #tpu.memory_space<vmem>>, %arg9: memref<1x32xf32, #tpu.memory_space<vmem>>, %arg10: memref<1x32xf32, #tpu.memory_space<vmem>>, %arg11: memref<1x16x32xf32, #tpu.memory_space<vmem>>, %arg12: memref<1x16x32xf32, #tpu.memory_space<vmem>>) attributes {dimension_semantics = [#tpu.dimension_semantics<parallel>, #tpu.dimension_semantics<parallel>], iteration_bounds = array<i64: 2, 1>, scalar_prefetch = 0 : i64, scratch_operands = 1 : i64, tpu.core_type = #tpu.core_type<tc>, window_params = [{transform_indices = @transform_0, window_bounds = array<i64: 1, 16, 32>}, {transform_indices = @transform_1, window_bounds = array<i64: 1, 16, 32>}, {transform_indices = @transform_2, window_bounds = array<i64: 1, 16, 32>}, {transform_indices = @transform_3, window_bounds = array<i64: 1, 1, 16>}, {transform_indices = @transform_4, window_bounds = array<i64: 1, 16, 32>}, {pipeline_mode = #tpu.pipeline_mode<synchronous>, transform_indices = @transform_5, window_bounds = array<i64: 32, 32>}, {pipeline_mode = #tpu.pipeline_mode<synchronous>, transform_indices = @transform_6, window_bounds = array<i64: 1, 32>}, {pipeline_mode = #tpu.pipeline_mode<synchronous>, transform_indices = @transform_7, window_bounds = array<i64: 1, 32>}, {pipeline_mode = #tpu.pipeline_mode<synchronous>, transform_indices = @transform_8, window_bounds = array<i64: 1, 32>}, {transform_indices = @transform_9, window_bounds = array<i64: 1, 16, 32>}]} {
    %c0 = arith.constant 0 : index
    %c0_0 = arith.constant 0 : index
    %c0_1 = arith.constant 0 : index
    %0 = vector.load %arg2[%c0, %c0_0, %c0_1] : memref<1x16x32xf32, #tpu.memory_space<vmem>>, vector<1x16x32xf32>
    %cst = arith.constant 0.353553385 : f32
    %1 = vector.broadcast %cst : f32 to vector<1x16x32xf32>
    %2 = arith.mulf %0, %1 : vector<1x16x32xf32>
    %c0_2 = arith.constant 0 : index
    %c0_3 = arith.constant 0 : index
    %c0_4 = arith.constant 0 : index
    %3 = vector.load %arg3[%c0_2, %c0_3, %c0_4] : memref<1x16x32xf32, #tpu.memory_space<vmem>>, vector<1x16x32xf32>
    %c0_5 = arith.constant 0 : index
    %c0_6 = arith.constant 0 : index
    %c0_7 = arith.constant 0 : index
    %4 = vector.load %arg4[%c0_5, %c0_6, %c0_7] : memref<1x16x32xf32, #tpu.memory_space<vmem>>, vector<1x16x32xf32>
    %c0_8 = arith.constant 0 : index
    %c0_9 = arith.constant 0 : index
    %c0_10 = arith.constant 0 : index
    %5 = vector.load %arg5[%c0_8, %c0_9, %c0_10] : memref<1x1x16xf32, #tpu.memory_space<vmem>>, vector<1x1x16xf32>
    %6 = vector.extract_strided_slice %2 {offsets = [0, 0, 0], sizes = [1, 16, 8], strides = [1, 1, 1]} : vector<1x16x32xf32> to vector<1x16x8xf32>
    %7 = vector.extract_strided_slice %3 {offsets = [0, 0, 0], sizes = [1, 16, 8], strides = [1, 1, 1]} : vector<1x16x32xf32> to vector<1x16x8xf32>
    "tpu.trace_start"() <{level = 10 : i32, message = "bqd,bkd->bqk"}> : () -> ()
    %cst_11 = arith.constant dense<0.000000e+00> : vector<1x16x16xf32>
    %8 = tpu.matmul %6, %7, %cst_11 {dimension_numbers = #tpu.dot_dimension_numbers<[2], [2], [1], [1], [0, 0, 0, 1, 1, 1], [0], [0]>} : vector<1x16x8xf32>, vector<1x16x8xf32>, vector<1x16x16xf32> -> vector<1x16x16xf32>
    "tpu.trace_stop"() : () -> ()
    %9 = vector.broadcast %5 : vector<1x1x16xf32> to vector<1x16x16xf32>
    %10 = arith.addf %8, %9 : vector<1x16x16xf32>
    %cst_12 = arith.constant dense<0xFF800000> : vector<1x16xf32>
    %11 = vector.multi_reduction <maximumf>, %10, %cst_12 [2] : vector<1x16x16xf32> to vector<1x16xf32>
    %12 = vector.shape_cast %11 : vector<1x16xf32> to vector<1x16x1xf32>
    %13 = vector.broadcast %12 : vector<1x16x1xf32> to vector<1x16x16xf32>
    %14 = arith.subf %10, %13 : vector<1x16x16xf32>
    %15 = math.exp %14 : vector<1x16x16xf32>
    %cst_13 = arith.constant dense<0.000000e+00> : vector<1x16xf32>
    %16 = vector.multi_reduction <add>, %15, %cst_13 [2] : vector<1x16x16xf32> to vector<1x16xf32>
    %17 = vector.shape_cast %16 : vector<1x16xf32> to vector<1x16x1xf32>
    %18 = vector.broadcast %17 : vector<1x16x1xf32> to vector<1x16x16xf32>
    %19 = arith.divf %15, %18 : vector<1x16x16xf32>
    %20 = vector.extract_strided_slice %4 {offsets = [0, 0, 0], sizes = [1, 16, 8], strides = [1, 1, 1]} : vector<1x16x32xf32> to vector<1x16x8xf32>
    "tpu.trace_start"() <{level = 10 : i32, message = "bqk,bkd->bqd"}> : () -> ()
    %cst_14 = arith.constant dense<0.000000e+00> : vector<1x16x8xf32>
    %21 = tpu.matmul %19, %20, %cst_14 {dimension_numbers = #tpu.dot_dimension_numbers<[2], [1], [1], [2], [0, 0, 0, 1, 1, 2], [0], [0]>} : vector<1x16x16xf32>, vector<1x16x8xf32>, vector<1x16x8xf32> -> vector<1x16x8xf32>
    "tpu.trace_stop"() : () -> ()
    %c0_15 = arith.constant 0 : index
    %c0_16 = arith.constant 0 : index
    %c0_17 = arith.constant 0 : index
    %22 = vector.load %arg12[%c0_15, %c0_16, %c0_17] : memref<1x16x32xf32, #tpu.memory_space<vmem>>, vector<1x16x8xf32>
    tpu.vector_store %arg12[%c0_15, %c0_16, %c0_17], %21 {strides = array<i32>} : memref<1x16x32xf32, #tpu.memory_space<vmem>>, vector<1x16x8xf32>,
    %23 = vector.extract_strided_slice %2 {offsets = [0, 0, 8], sizes = [1, 16, 8], strides = [1, 1, 1]} : vector<1x16x32xf32> to vector<1x16x8xf32>
    %24 = vector.extract_strided_slice %3 {offsets = [0, 0, 8], sizes = [1, 16, 8], strides = [1, 1, 1]} : vector<1x16x32xf32> to vector<1x16x8xf32>
    "tpu.trace_start"() <{level = 10 : i32, message = "bqd,bkd->bqk"}> : () -> ()
    %cst_18 = arith.constant dense<0.000000e+00> : vector<1x16x16xf32>
    %25 = tpu.matmul %23, %24, %cst_18 {dimension_numbers = #tpu.dot_dimension_numbers<[2], [2], [1], [1], [0, 0, 0, 1, 1, 1], [0], [0]>} : vector<1x16x8xf32>, vector<1x16x8xf32>, vector<1x16x16xf32> -> vector<1x16x16xf32>
    "tpu.trace_stop"() : () -> ()
    %26 = vector.broadcast %5 : vector<1x1x16xf32> to vector<1x16x16xf32>
    %27 = arith.addf %25, %26 : vector<1x16x16xf32>
    %cst_19 = arith.constant dense<0xFF800000> : vector<1x16xf32>
    %28 = vector.multi_reduction <maximumf>, %27, %cst_19 [2] : vector<1x16x16xf32> to vector<1x16xf32>
    %29 = vector.shape_cast %28 : vector<1x16xf32> to vector<1x16x1xf32>
    %30 = vector.broadcast %29 : vector<1x16x1xf32> to vector<1x16x16xf32>
    %31 = arith.subf %27, %30 : vector<1x16x16xf32>
    %32 = math.exp %31 : vector<1x16x16xf32>
    %cst_20 = arith.constant dense<0.000000e+00> : vector<1x16xf32>
    %33 = vector.multi_reduction <add>, %32, %cst_20 [2] : vector<1x16x16xf32> to vector<1x16xf32>
    %34 = vector.shape_cast %33 : vector<1x16xf32> to vector<1x16x1xf32>
    %35 = vector.broadcast %34 : vector<1x16x1xf32> to vector<1x16x16xf32>
    %36 = arith.divf %32, %35 : vector<1x16x16xf32>
    %37 = vector.extract_strided_slice %4 {offsets = [0, 0, 8], sizes = [1, 16, 8], strides = [1, 1, 1]} : vector<1x16x32xf32> to vector<1x16x8xf32>
    "tpu.trace_start"() <{level = 10 : i32, message = "bqk,bkd->bqd"}> : () -> ()
    %cst_21 = arith.constant dense<0.000000e+00> : vector<1x16x8xf32>
    %38 = tpu.matmul %36, %37, %cst_21 {dimension_numbers = #tpu.dot_dimension_numbers<[2], [1], [1], [2], [0, 0, 0, 1, 1, 2], [0], [0]>} : vector<1x16x16xf32>, vector<1x16x8xf32>, vector<1x16x8xf32> -> vector<1x16x8xf32>
    "tpu.trace_stop"() : () -> ()
    %c0_22 = arith.constant 0 : index
    %c0_23 = arith.constant 0 : index
    %c8 = arith.constant 8 : index
    %39 = vector.load %arg12[%c0_22, %c0_23, %c8] : memref<1x16x32xf32, #tpu.memory_space<vmem>>, vector<1x16x8xf32>
    tpu.vector_store %arg12[%c0_22, %c0_23, %c8], %38 {strides = array<i32>} : memref<1x16x32xf32, #tpu.memory_space<vmem>>, vector<1x16x8xf32>,
    %40 = vector.extract_strided_slice %2 {offsets = [0, 0, 16], sizes = [1, 16, 8], strides = [1, 1, 1]} : vector<1x16x32xf32> to vector<1x16x8xf32>
    %41 = vector.extract_strided_slice %3 {offsets = [0, 0, 16], sizes = [1, 16, 8], strides = [1, 1, 1]} : vector<1x16x32xf32> to vector<1x16x8xf32>
    "tpu.trace_start"() <{level = 10 : i32, message = "bqd,bkd->bqk"}> : () -> ()
    %cst_24 = arith.constant dense<0.000000e+00> : vector<1x16x16xf32>
    %42 = tpu.matmul %40, %41, %cst_24 {dimension_numbers = #tpu.dot_dimension_numbers<[2], [2], [1], [1], [0, 0, 0, 1, 1, 1], [0], [0]>} : vector<1x16x8xf32>, vector<1x16x8xf32>, vector<1x16x16xf32> -> vector<1x16x16xf32>
    "tpu.trace_stop"() : () -> ()
    %43 = vector.broadcast %5 : vector<1x1x16xf32> to vector<1x16x16xf32>
    %44 = arith.addf %42, %43 : vector<1x16x16xf32>
    %cst_25 = arith.constant dense<0xFF800000> : vector<1x16xf32>
    %45 = vector.multi_reduction <maximumf>, %44, %cst_25 [2] : vector<1x16x16xf32> to vector<1x16xf32>
    %46 = vector.shape_cast %45 : vector<1x16xf32> to vector<1x16x1xf32>
    %47 = vector.broadcast %46 : vector<1x16x1xf32> to vector<1x16x16xf32>
    %48 = arith.subf %44, %47 : vector<1x16x16xf32>
    %49 = math.exp %48 : vector<1x16x16xf32>
    %cst_26 = arith.constant dense<0.000000e+00> : vector<1x16xf32>
    %50 = vector.multi_reduction <add>, %49, %cst_26 [2] : vector<1x16x16xf32> to vector<1x16xf32>
    %51 = vector.shape_cast %50 : vector<1x16xf32> to vector<1x16x1xf32>
    %52 = vector.broadcast %51 : vector<1x16x1xf32> to vector<1x16x16xf32>
    %53 = arith.divf %49, %52 : vector<1x16x16xf32>
    %54 = vector.extract_strided_slice %4 {offsets = [0, 0, 16], sizes = [1, 16, 8], strides = [1, 1, 1]} : vector<1x16x32xf32> to vector<1x16x8xf32>
    "tpu.trace_start"() <{level = 10 : i32, message = "bqk,bkd->bqd"}> : () -> ()
    %cst_27 = arith.constant dense<0.000000e+00> : vector<1x16x8xf32>
    %55 = tpu.matmul %53, %54, %cst_27 {dimension_numbers = #tpu.dot_dimension_numbers<[2], [1], [1], [2], [0, 0, 0, 1, 1, 2], [0], [0]>} : vector<1x16x16xf32>, vector<1x16x8xf32>, vector<1x16x8xf32> -> vector<1x16x8xf32>
    "tpu.trace_stop"() : () -> ()
    %c0_28 = arith.constant 0 : index
    %c0_29 = arith.constant 0 : index
    %c16 = arith.constant 16 : index
    %56 = vector.load %arg12[%c0_28, %c0_29, %c16] : memref<1x16x32xf32, #tpu.memory_space<vmem>>, vector<1x16x8xf32>
    tpu.vector_store %arg12[%c0_28, %c0_29, %c16], %55 {strides = array<i32>} : memref<1x16x32xf32, #tpu.memory_space<vmem>>, vector<1x16x8xf32>,
    %57 = vector.extract_strided_slice %2 {offsets = [0, 0, 24], sizes = [1, 16, 8], strides = [1, 1, 1]} : vector<1x16x32xf32> to vector<1x16x8xf32>
    %58 = vector.extract_strided_slice %3 {offsets = [0, 0, 24], sizes = [1, 16, 8], strides = [1, 1, 1]} : vector<1x16x32xf32> to vector<1x16x8xf32>
    "tpu.trace_start"() <{level = 10 : i32, message = "bqd,bkd->bqk"}> : () -> ()
    %cst_30 = arith.constant dense<0.000000e+00> : vector<1x16x16xf32>
    %59 = tpu.matmul %57, %58, %cst_30 {dimension_numbers = #tpu.dot_dimension_numbers<[2], [2], [1], [1], [0, 0, 0, 1, 1, 1], [0], [0]>} : vector<1x16x8xf32>, vector<1x16x8xf32>, vector<1x16x16xf32> -> vector<1x16x16xf32>
    "tpu.trace_stop"() : () -> ()
    %60 = vector.broadcast %5 : vector<1x1x16xf32> to vector<1x16x16xf32>
    %61 = arith.addf %59, %60 : vector<1x16x16xf32>
    %cst_31 = arith.constant dense<0xFF800000> : vector<1x16xf32>
    %62 = vector.multi_reduction <maximumf>, %61, %cst_31 [2] : vector<1x16x16xf32> to vector<1x16xf32>
    %63 = vector.shape_cast %62 : vector<1x16xf32> to vector<1x16x1xf32>
    %64 = vector.broadcast %63 : vector<1x16x1xf32> to vector<1x16x16xf32>
    %65 = arith.subf %61, %64 : vector<1x16x16xf32>
    %66 = math.exp %65 : vector<1x16x16xf32>
    %cst_32 = arith.constant dense<0.000000e+00> : vector<1x16xf32>
    %67 = vector.multi_reduction <add>, %66, %cst_32 [2] : vector<1x16x16xf32> to vector<1x16xf32>
    %68 = vector.shape_cast %67 : vector<1x16xf32> to vector<1x16x1xf32>
    %69 = vector.broadcast %68 : vector<1x16x1xf32> to vector<1x16x16xf32>
    %70 = arith.divf %66, %69 : vector<1x16x16xf32>
    %71 = vector.extract_strided_slice %4 {offsets = [0, 0, 24], sizes = [1, 16, 8], strides = [1, 1, 1]} : vector<1x16x32xf32> to vector<1x16x8xf32>
    "tpu.trace_start"() <{level = 10 : i32, message = "bqk,bkd->bqd"}> : () -> ()
    %cst_33 = arith.constant dense<0.000000e+00> : vector<1x16x8xf32>
    %72 = tpu.matmul %70, %71, %cst_33 {dimension_numbers = #tpu.dot_dimension_numbers<[2], [1], [1], [2], [0, 0, 0, 1, 1, 2], [0], [0]>} : vector<1x16x16xf32>, vector<1x16x8xf32>, vector<1x16x8xf32> -> vector<1x16x8xf32>
    "tpu.trace_stop"() : () -> ()
    %c0_34 = arith.constant 0 : index
    %c0_35 = arith.constant 0 : index
    %c24 = arith.constant 24 : index
    %73 = vector.load %arg12[%c0_34, %c0_35, %c24] : memref<1x16x32xf32, #tpu.memory_space<vmem>>, vector<1x16x8xf32>
    tpu.vector_store %arg12[%c0_34, %c0_35, %c24], %72 {strides = array<i32>} : memref<1x16x32xf32, #tpu.memory_space<vmem>>, vector<1x16x8xf32>,
    %c0_36 = arith.constant 0 : index
    %c0_37 = arith.constant 0 : index
    %c0_38 = arith.constant 0 : index
    %74 = vector.load %arg12[%c0_36, %c0_37, %c0_38] : memref<1x16x32xf32, #tpu.memory_space<vmem>>, vector<1x16x32xf32>
    %75 = vector.shape_cast %74 : vector<1x16x32xf32> to vector<16x32xf32>
    %c0_39 = arith.constant 0 : index
    %c0_40 = arith.constant 0 : index
    %76 = vector.load %arg7[%c0_39, %c0_40] : memref<32x32xf32, #tpu.memory_space<vmem>>, vector<32x32xf32>
    %cst_41 = arith.constant dense<0.000000e+00> : vector<16x32xf32>
    %77 = tpu.matmul %75, %76, %cst_41 {dimension_numbers = #tpu.dot_dimension_numbers<[1], [0], [0], [1], [0, 0, 1, 1], [], []>} : vector<16x32xf32>, vector<32x32xf32>, vector<16x32xf32> -> vector<16x32xf32>
    %78 = vector.shape_cast %77 : vector<16x32xf32> to vector<1x16x32xf32>
    %c0_42 = arith.constant 0 : index
    %c0_43 = arith.constant 0 : index
    %79 = vector.load %arg8[%c0_42, %c0_43] : memref<1x32xf32, #tpu.memory_space<vmem>>, vector<1x32xf32>
    %80 = vector.shape_cast %79 : vector<1x32xf32> to vector<1x1x32xf32>
    %81 = vector.broadcast %80 : vector<1x1x32xf32> to vector<1x16x32xf32>
    %82 = arith.addf %78, %81 : vector<1x16x32xf32>
    %c0_44 = arith.constant 0 : index
    %c0_45 = arith.constant 0 : index
    %c0_46 = arith.constant 0 : index
    %83 = vector.load %arg6[%c0_44, %c0_45, %c0_46] : memref<1x16x32xf32, #tpu.memory_space<vmem>>, vector<1x16x32xf32>
    %84 = arith.addf %82, %83 : vector<1x16x32xf32>
    %cst_47 = arith.constant dense<0.000000e+00> : vector<1x16xf32>
    %85 = vector.multi_reduction <add>, %84, %cst_47 [2] : vector<1x16x32xf32> to vector<1x16xf32>
    %86 = vector.shape_cast %85 : vector<1x16xf32> to vector<1x16x1xf32>
    %cst_48 = arith.constant 3.200000e+01 : f32
    %87 = vector.broadcast %cst_48 : f32 to vector<1x16x1xf32>
    %88 = arith.divf %86, %87 : vector<1x16x1xf32>
    %89 = vector.broadcast %88 : vector<1x16x1xf32> to vector<1x16x32xf32>
    %90 = arith.subf %84, %89 : vector<1x16x32xf32>
    %91 = arith.mulf %90, %90 : vector<1x16x32xf32>
    %cst_49 = arith.constant dense<0.000000e+00> : vector<1x16xf32>
    %92 = vector.multi_reduction <add>, %91, %cst_49 [2] : vector<1x16x32xf32> to vector<1x16xf32>
    %93 = vector.shape_cast %92 : vector<1x16xf32> to vector<1x16x1xf32>
    %cst_50 = arith.constant 3.200000e+01 : f32
    %94 = vector.broadcast %cst_50 : f32 to vector<1x16x1xf32>
    %95 = arith.divf %93, %94 : vector<1x16x1xf32>
    %96 = vector.broadcast %88 : vector<1x16x1xf32> to vector<1x16x32xf32>
    %97 = arith.subf %84, %96 : vector<1x16x32xf32>
    %cst_51 = arith.constant 9.99999974E-6 : f32
    %98 = vector.broadcast %cst_51 : f32 to vector<1x16x1xf32>
    %99 = arith.addf %95, %98 : vector<1x16x1xf32>
    %100 = math.rsqrt %99 : vector<1x16x1xf32>
    %101 = vector.broadcast %100 : vector<1x16x1xf32> to vector<1x16x32xf32>
    %102 = arith.mulf %97, %101 : vector<1x16x32xf32>
    %c0_52 = arith.constant 0 : index
    %c0_53 = arith.constant 0 : index
    %103 = vector.load %arg9[%c0_52, %c0_53] : memref<1x32xf32, #tpu.memory_space<vmem>>, vector<1x32xf32>
    %104 = vector.shape_cast %103 : vector<1x32xf32> to vector<1x1x32xf32>
    %105 = vector.broadcast %104 : vector<1x1x32xf32> to vector<1x16x32xf32>
    %106 = arith.mulf %102, %105 : vector<1x16x32xf32>
    %c0_54 = arith.constant 0 : index
    %c0_55 = arith.constant 0 : index
    %107 = vector.load %arg10[%c0_54, %c0_55] : memref<1x32xf32, #tpu.memory_space<vmem>>, vector<1x32xf32>
    %108 = vector.shape_cast %107 : vector<1x32xf32> to vector<1x1x32xf32>
    %109 = vector.broadcast %108 : vector<1x1x32xf32> to vector<1x16x32xf32>
    %110 = arith.addf %106, %109 : vector<1x16x32xf32>
    %c0_56 = arith.constant 0 : index
    %c0_57 = arith.constant 0 : index
    %c0_58 = arith.constant 0 : index
    %111 = vector.load %arg11[%c0_56, %c0_57, %c0_58] : memref<1x16x32xf32, #tpu.memory_space<vmem>>, vector<1x16x32xf32>
    tpu.vector_store %arg11[%c0_56, %c0_57, %c0_58], %110 {strides = array<i32>} : memref<1x16x32xf32, #tpu.memory_space<vmem>>, vector<1x16x32xf32>,
    return
  }
  func.func @transform_0(%arg0: i32, %arg1: i32) -> (i32, i32, i32) {
    %c0_i32 = arith.constant 0 : i32
    %c0_i32_0 = arith.constant 0 : i32
    return %arg0, %arg1, %c0_i32 : i32, i32, i32
  }
  func.func @transform_1(%arg0: i32, %arg1: i32) -> (i32, i32, i32) {
    %c0_i32 = arith.constant 0 : i32
    %c0_i32_0 = arith.constant 0 : i32
    %c0_i32_1 = arith.constant 0 : i32
    return %arg0, %c0_i32, %c0_i32_0 : i32, i32, i32
  }
  func.func @transform_2(%arg0: i32, %arg1: i32) -> (i32, i32, i32) {
    %c0_i32 = arith.constant 0 : i32
    %c0_i32_0 = arith.constant 0 : i32
    %c0_i32_1 = arith.constant 0 : i32
    return %arg0, %c0_i32, %c0_i32_0 : i32, i32, i32
  }
  func.func @transform_3(%arg0: i32, %arg1: i32) -> (i32, i32, i32) {
    %c0_i32 = arith.constant 0 : i32
    %c0_i32_0 = arith.constant 0 : i32
    %c0_i32_1 = arith.constant 0 : i32
    return %arg0, %c0_i32, %c0_i32_0 : i32, i32, i32
  }
  func.func @transform_4(%arg0: i32, %arg1: i32) -> (i32, i32, i32) {
    %c0_i32 = arith.constant 0 : i32
    %c0_i32_0 = arith.constant 0 : i32
    return %arg0, %arg1, %c0_i32 : i32, i32, i32
  }
  func.func @transform_5(%arg0: i32, %arg1: i32) -> (i32, i32) {
    %c0_i32 = arith.constant 0 : i32
    %c0_i32_0 = arith.constant 0 : i32
    %c0_i32_1 = arith.constant 0 : i32
    return %c0_i32, %c0_i32_0 : i32, i32
  }
  func.func @transform_6(%arg0: i32, %arg1: i32) -> (i32, i32) {
    %c0_i32 = arith.constant 0 : i32
    %c0_i32_0 = arith.constant 0 : i32
    %c0_i32_1 = arith.constant 0 : i32
    return %c0_i32, %c0_i32_0 : i32, i32
  }
  func.func @transform_7(%arg0: i32, %arg1: i32) -> (i32, i32) {
    %c0_i32 = arith.constant 0 : i32
    %c0_i32_0 = arith.constant 0 : i32
    %c0_i32_1 = arith.constant 0 : i32
    return %c0_i32, %c0_i32_0 : i32, i32
  }
  func.func @transform_8(%arg0: i32, %arg1: i32) -> (i32, i32) {
    %c0_i32 = arith.constant 0 : i32
    %c0_i32_0 = arith.constant 0 : i32
    %c0_i32_1 = arith.constant 0 : i32
    return %c0_i32, %c0_i32_0 : i32, i32
  }
  func.func @transform_9(%arg0: i32, %arg1: i32) -> (i32, i32, i32) {
    %c0_i32 = arith.constant 0 : i32
    %c0_i32_0 = arith.constant 0 : i32
    return %arg0, %arg1, %c0_i32 : i32, i32, i32
  }
}

module attributes {stable_mosaic.version = 11 : i64} {
  func.func @_ffn_add_ln_kernel(%arg0: i32, %arg1: memref<32x32xf32, #tpu.memory_space<vmem>>, %arg2: memref<32x64xf32, #tpu.memory_space<vmem>>, %arg3: memref<1x64xf32, #tpu.memory_space<vmem>>, %arg4: memref<64x32xf32, #tpu.memory_space<vmem>>, %arg5: memref<1x32xf32, #tpu.memory_space<vmem>>, %arg6: memref<1x32xf32, #tpu.memory_space<vmem>>, %arg7: memref<1x32xf32, #tpu.memory_space<vmem>>, %arg8: memref<32x32xf32, #tpu.memory_space<vmem>>) attributes {dimension_semantics = [#tpu.dimension_semantics<parallel>], iteration_bounds = array<i64: 1>, scalar_prefetch = 0 : i64, scratch_operands = 0 : i64, tpu.core_type = #tpu.core_type<tc>, window_params = [{transform_indices = @transform_0, window_bounds = array<i64: 32, 32>}, {pipeline_mode = #tpu.pipeline_mode<synchronous>, transform_indices = @transform_1, window_bounds = array<i64: 32, 64>}, {pipeline_mode = #tpu.pipeline_mode<synchronous>, transform_indices = @transform_2, window_bounds = array<i64: 1, 64>}, {pipeline_mode = #tpu.pipeline_mode<synchronous>, transform_indices = @transform_3, window_bounds = array<i64: 64, 32>}, {pipeline_mode = #tpu.pipeline_mode<synchronous>, transform_indices = @transform_4, window_bounds = array<i64: 1, 32>}, {pipeline_mode = #tpu.pipeline_mode<synchronous>, transform_indices = @transform_5, window_bounds = array<i64: 1, 32>}, {pipeline_mode = #tpu.pipeline_mode<synchronous>, transform_indices = @transform_6, window_bounds = array<i64: 1, 32>}, {transform_indices = @transform_7, window_bounds = array<i64: 32, 32>}]} {
    %c0 = arith.constant 0 : index
    %c0_0 = arith.constant 0 : index
    %0 = vector.load %arg1[%c0, %c0_0] : memref<32x32xf32, #tpu.memory_space<vmem>>, vector<32x32xf32>
    %c0_1 = arith.constant 0 : index
    %c0_2 = arith.constant 0 : index
    %1 = vector.load %arg2[%c0_1, %c0_2] : memref<32x64xf32, #tpu.memory_space<vmem>>, vector<32x64xf32>
    %cst = arith.constant dense<0.000000e+00> : vector<32x64xf32>
    %2 = tpu.matmul %0, %1, %cst {dimension_numbers = #tpu.dot_dimension_numbers<[1], [0], [0], [1], [0, 0, 1, 1], [], []>} : vector<32x32xf32>, vector<32x64xf32>, vector<32x64xf32> -> vector<32x64xf32>
    %c0_3 = arith.constant 0 : index
    %c0_4 = arith.constant 0 : index
    %3 = vector.load %arg3[%c0_3, %c0_4] : memref<1x64xf32, #tpu.memory_space<vmem>>, vector<1x64xf32>
    %4 = vector.broadcast %3 : vector<1x64xf32> to vector<32x64xf32>
    %5 = arith.addf %2, %4 : vector<32x64xf32>
    %cst_5 = arith.constant 0.000000e+00 : f32
    %6 = vector.broadcast %cst_5 : f32 to vector<32x64xf32>
    %7 = arith.maximumf %5, %6 : vector<32x64xf32>
    %c0_6 = arith.constant 0 : index
    %c0_7 = arith.constant 0 : index
    %8 = vector.load %arg4[%c0_6, %c0_7] : memref<64x32xf32, #tpu.memory_space<vmem>>, vector<64x32xf32>
    %cst_8 = arith.constant dense<0.000000e+00> : vector<32x32xf32>
    %9 = tpu.matmul %7, %8, %cst_8 {dimension_numbers = #tpu.dot_dimension_numbers<[1], [0], [0], [1], [0, 0, 1, 1], [], []>} : vector<32x64xf32>, vector<64x32xf32>, vector<32x32xf32> -> vector<32x32xf32>
    %c0_9 = arith.constant 0 : index
    %c0_10 = arith.constant 0 : index
    %10 = vector.load %arg5[%c0_9, %c0_10] : memref<1x32xf32, #tpu.memory_space<vmem>>, vector<1x32xf32>
    %11 = vector.broadcast %10 : vector<1x32xf32> to vector<32x32xf32>
    %12 = arith.addf %9, %11 : vector<32x32xf32>
    %13 = arith.addf %12, %0 : vector<32x32xf32>
    %cst_11 = arith.constant dense<0.000000e+00> : vector<32xf32>
    %14 = vector.multi_reduction <add>, %13, %cst_11 [1] : vector<32x32xf32> to vector<32xf32>
    %15 = vector.shape_cast %14 : vector<32xf32> to vector<32x1xf32>
    %cst_12 = arith.constant 3.200000e+01 : f32
    %16 = vector.broadcast %cst_12 : f32 to vector<32x1xf32>
    %17 = arith.divf %15, %16 : vector<32x1xf32>
    %18 = vector.broadcast %17 : vector<32x1xf32> to vector<32x32xf32>
    %19 = arith.subf %13, %18 : vector<32x32xf32>
    %20 = arith.mulf %19, %19 : vector<32x32xf32>
    %cst_13 = arith.constant dense<0.000000e+00> : vector<32xf32>
    %21 = vector.multi_reduction <add>, %20, %cst_13 [1] : vector<32x32xf32> to vector<32xf32>
    %22 = vector.shape_cast %21 : vector<32xf32> to vector<32x1xf32>
    %cst_14 = arith.constant 3.200000e+01 : f32
    %23 = vector.broadcast %cst_14 : f32 to vector<32x1xf32>
    %24 = arith.divf %22, %23 : vector<32x1xf32>
    %25 = vector.broadcast %17 : vector<32x1xf32> to vector<32x32xf32>
    %26 = arith.subf %13, %25 : vector<32x32xf32>
    %cst_15 = arith.constant 9.99999974E-6 : f32
    %27 = vector.broadcast %cst_15 : f32 to vector<32x1xf32>
    %28 = arith.addf %24, %27 : vector<32x1xf32>
    %29 = math.rsqrt %28 : vector<32x1xf32>
    %30 = vector.broadcast %29 : vector<32x1xf32> to vector<32x32xf32>
    %31 = arith.mulf %26, %30 : vector<32x32xf32>
    %c0_16 = arith.constant 0 : index
    %c0_17 = arith.constant 0 : index
    %32 = vector.load %arg6[%c0_16, %c0_17] : memref<1x32xf32, #tpu.memory_space<vmem>>, vector<1x32xf32>
    %33 = vector.broadcast %32 : vector<1x32xf32> to vector<32x32xf32>
    %34 = arith.mulf %31, %33 : vector<32x32xf32>
    %c0_18 = arith.constant 0 : index
    %c0_19 = arith.constant 0 : index
    %35 = vector.load %arg7[%c0_18, %c0_19] : memref<1x32xf32, #tpu.memory_space<vmem>>, vector<1x32xf32>
    %36 = vector.broadcast %35 : vector<1x32xf32> to vector<32x32xf32>
    %37 = arith.addf %34, %36 : vector<32x32xf32>
    %c0_20 = arith.constant 0 : index
    %c0_21 = arith.constant 0 : index
    %38 = vector.load %arg8[%c0_20, %c0_21] : memref<32x32xf32, #tpu.memory_space<vmem>>, vector<32x32xf32>
    tpu.vector_store %arg8[%c0_20, %c0_21], %37 {strides = array<i32>} : memref<32x32xf32, #tpu.memory_space<vmem>>, vector<32x32xf32>,
    return
  }
  func.func @transform_0(%arg0: i32) -> (i32, i32) {
    %c0_i32 = arith.constant 0 : i32
    %c0_i32_0 = arith.constant 0 : i32
    return %arg0, %c0_i32 : i32, i32
  }
  func.func @transform_1(%arg0: i32) -> (i32, i32) {
    %c0_i32 = arith.constant 0 : i32
    %c0_i32_0 = arith.constant 0 : i32
    %c0_i32_1 = arith.constant 0 : i32
    return %c0_i32, %c0_i32_0 : i32, i32
  }
  func.func @transform_2(%arg0: i32) -> (i32, i32) {
    %c0_i32 = arith.constant 0 : i32
    %c0_i32_0 = arith.constant 0 : i32
    %c0_i32_1 = arith.constant 0 : i32
    return %c0_i32, %c0_i32_0 : i32, i32
  }
  func.func @transform_3(%arg0: i32) -> (i32, i32) {
    %c0_i32 = arith.constant 0 : i32
    %c0_i32_0 = arith.constant 0 : i32
    %c0_i32_1 = arith.constant 0 : i32
    return %c0_i32, %c0_i32_0 : i32, i32
  }
  func.func @transform_4(%arg0: i32) -> (i32, i32) {
    %c0_i32 = arith.constant 0 : i32
    %c0_i32_0 = arith.constant 0 : i32
    %c0_i32_1 = arith.constant 0 : i32
    return %c0_i32, %c0_i32_0 : i32, i32
  }
  func.func @transform_5(%arg0: i32) -> (i32, i32) {
    %c0_i32 = arith.constant 0 : i32
    %c0_i32_0 = arith.constant 0 : i32
    %c0_i32_1 = arith.constant 0 : i32
    return %c0_i32, %c0_i32_0 : i32, i32
  }
  func.func @transform_6(%arg0: i32) -> (i32, i32) {
    %c0_i32 = arith.constant 0 : i32
    %c0_i32_0 = arith.constant 0 : i32
    %c0_i32_1 = arith.constant 0 : i32
    return %c0_i32, %c0_i32_0 : i32, i32
  }
  func.func @transform_7(%arg0: i32) -> (i32, i32) {
    %c0_i32 = arith.constant 0 : i32
    %c0_i32_0 = arith.constant 0 : i32
    return %arg0, %c0_i32 : i32, i32
  }
}

</mosaic_0001>

<bundles_post_ra>
// kernel: encoder_layer_forward.3
= control target key start
LH: loop header
LB: loop body
LE: loop exit
PB: predicated region body
PF: predicated region fallthrough
CT: control target
= control target key end

     0   :  { %vm49_vm0 = vcmask 261120   ;;  %s506_s2 = inlined_call_operand.vmem [shape: f32[32,64], index: 2, kind: input, shape index: {}]   ;;  %s507_s0 = inlined_call_operand.vmem [shape: f32[32,32], index: 0, kind: input, shape index: {}]   ;;  %s508_s1 = inlined_call_operand.vmem [shape: f32[32,32], index: 1, kind: input, shape index: {}]   ;;  %s509_s4 = inlined_call_operand.vmem [shape: f32[32,32], index: 4, kind: input, shape index: {}]   ;;  %s510_s3 = inlined_call_operand.vmem [shape: f32[1,64], index: 3, kind: input, shape index: {}]   ;;  %s511_s5 = inlined_call_operand.vmem [shape: f32[1,32], index: 5, kind: input, shape index: {}]   ;;  %s512_s6 = inlined_call_operand.vmem [shape: f32[32,32], index: 6, kind: output, shape index: {0}]   ;;  %s513_s8 = inlined_call_operand.vmem [shape: f32[32,32], index: 8, kind: output, shape index: {2}]   ;;  %s514_s7 = inlined_call_operand.vmem [shape: f32[32,32], index: 7, kind: output, shape index: {1}]  }
   0x1   :  { %v41_v0 = vld [vmem:[%s506_s2 + $0x18] sm:$0xff]  ;;  %v40_v1 = vld [vmem:[%s506_s2 + $0x10] sm:$0xff]  ;;  %v26_v2 = vld [vmem:[%s507_s0] sm:$0xff] }
   0x2   :  { %321 = vmatprep.subr.mxu0 %v41_v0  ;;  %v30_v3 = vld [vmem:[%s508_s1] sm:$0xff]  ;;  %v39_v4 = vld [vmem:[%s506_s2 + $0x8] sm:$0xff]  ;;  %343 = vmatprep.mubr.msk.f32.mxu1 %vm49_vm0, %v26_v2  ;;  %v28_v8 = vld [vmem:[%s507_s0 + $0x10] sm:$0xff] }
   0x3   :  { %322 = vmatpush3.msra.mxu0 %v41_v0  ;;  %v34_v5 = vadd.f32 %v30_v3, %v26_v2  ;;  %v27_v6 = vld [vmem:[%s507_s0 + $0x8] sm:$0xff]  ;;  %v32_v9 = vld [vmem:[%s508_s1 + $0x10] sm:$0xff]  ;;  %v38_v10 = vld [vmem:[%s506_s2] sm:$0xff] }
   0x4   :  { %v31_v7 = vld [vmem:[%s508_s1 + $0x8] sm:$0xff]  ;;  %323 = vmatprep.subr.mxu0 %v40_v1  ;;  %v174_v11 = vld [vmem:[%s509_s4 + $0x18] sm:$0xff]  ;;  %v173_v12 = vld [vmem:[%s509_s4 + $0x10] sm:$0xff]  ;;  %v36_v14 = vadd.f32 %v32_v9, %v28_v8 }
   0x5   :  { %324 = vmatpush3.msra.mxu0 %v40_v1  ;;  %329 = vmatprep.mubr.msk.f32.mxu0 %vm49_vm0, %v34_v5  ;;  %v35_v13 = vadd.f32 %v31_v7, %v27_v6  ;;  %v29_v15 = vld [vmem:[%s507_s0 + $0x18] sm:$0xff]  ;;  %v172_v17 = vld [vmem:[%s509_s4 + $0x8] sm:$0xff]  ;;  %v171_v18 = vld [vmem:[%s509_s4] sm:$0xff] }
   0x6   :  { %325 = vmatprep.subr.mxu0 %v39_v4  ;;  %335 = vmatprep.subr.mxu1 %v174_v11  ;;  %v33_v16 = vld [vmem:[%s508_s1 + $0x18] sm:$0xff]  ;;  %v295_v20 = vld [vmem:[%s510_s3] ss:$0 sm:$0xff]  ;;  %s350_s3 = smov 96  }
   0x7   :  { %326 = vmatpush3.msra.mxu0 %v39_v4  ;;  %336 = vmatpush3.msra.mxu1 %v174_v11  ;;  %v37_v19 = vadd.f32 %v33_v16, %v29_v15  ;;  %v300_v24 = vld [vmem:[%s511_s5] ss:$0 sm:$0xff] }
   0x8   :  { %327 = vmatprep.subr.mxu0 %v38_v10  ;;  %337 = vmatprep.subr.mxu1 %v173_v12 }
   0x9   :  { %328 = vmatpush3.msra.mxu0 %v38_v10  ;;  %338 = vmatpush3.msra.mxu1 %v173_v12 }
   0xa   :  { %330 = vmatmul.mubr.msk.f32.vlgmr.msra.gmra.mxu0 %vm49_vm0, %v35_v13  ;;  %339 = vmatprep.subr.mxu1 %v172_v17 }
   0xb   :  { %332 = vmatprep.mubr.msk.f32.mxu0 %vm49_vm0, %v36_v14  ;;  %340 = vmatpush3.msra.mxu1 %v172_v17 }
   0xc   :  { %341 = vmatprep.subr.mxu1 %v171_v18 }
   0xd   :  { %342 = vmatpush3.msra.mxu1 %v171_v18 }
   0xe   :  { %333 = vmatmul.mubr.msk.f32.gmra.mxu0 %vm49_vm0, %v37_v19  ;;  %344 = vmatmul.mubr.msk.f32.vlgmr.msra.gmra.mxu1 %vm49_vm0, %v27_v6 }
   0xf   :  { %346 = vmatprep.mubr.msk.f32.mxu1 %vm49_vm0, %v28_v8 }
  0x12   :  { %347 = vmatmul.mubr.msk.f32.gmra.mxu1 %vm49_vm0, %v29_v15 }
  0xca   :  { %v331_v21 = vpop.f32.mrf.mxu0 }
  0xcb   :  { %v134_v22 = vadd.f32 %v331_v21, %v295_v20 }
  0xcc   :  { %v128_v23 = vpop.f32.mrf.mxu0 }
  0xcd   :  { %148 = vst.msk [vmem:[%s512_s6 + $0x8] sm:$0xff] %vm49_vm0, %v134_v22  ;;  %v129_v25 = vadd.f32 %v295_v20, %v128_v23 }
  0xce   :  { %v334_v26 = vpop.f32.mrf.mxu0  ;;  %v345_v27 = vpop.f32.mrf.mxu1 }
  0xcf   :  { %147 = vst.msk [vmem:[%s512_s6] sm:$0xff] %vm49_vm0, %v129_v25  ;;  %v144_v28 = vadd.f32 %v334_v26, %v295_v20  ;;  %155 = vrot.lane.b32.xlu0 %v129_v25, %s350_s3  ;;  %v266_v29 = vadd.f32 %v345_v27, %v300_v24 }
  0xd0   :  { %v138_v30 = vpop.f32.mrf.mxu0  ;;  %v260_v31 = vpop.f32.mrf.mxu1 }
  0xd1   :  { %150 = vst.msk [vmem:[%s512_s6 + $0x18] sm:$0xff] %vm49_vm0, %v144_v28  ;;  %v139_v32 = vadd.f32 %v295_v20, %v138_v30  ;;  %280 = vst.msk [vmem:[%s513_s8 + $0x8] sm:$0xff] %vm49_vm0, %v266_v29  ;;  %v261_v33 = vadd.f32 %v300_v24, %v260_v31 }
  0xd2   :  { %v348_v34 = vpop.f32.mrf.mxu1 }
  0xd3   :  { %149 = vst.msk [vmem:[%s512_s6 + $0x10] sm:$0xff] %vm49_vm0, %v139_v32  ;;  %159 = vrot.lane.b32.xlu1 %v139_v32, %s350_s3  ;;  %157 = vrot.lane.b32.xlu0 %v134_v22, %s350_s3  ;;  %279 = vst.msk [vmem:[%s513_s8] sm:$0xff] %vm49_vm0, %v261_v33  ;;  %v276_v35 = vadd.f32 %v348_v34, %v300_v24 }
  0xd4   :  { %v270_v36 = vpop.f32.mrf.mxu1 }
  0xd5   :  { %282 = vst.msk [vmem:[%s513_s8 + $0x18] sm:$0xff] %vm49_vm0, %v276_v35  ;;  %v271_v37 = vadd.f32 %v300_v24, %v270_v36 }
  0xd7   :  { %161 = vrot.lane.b32.xlu1 %v144_v28, %s350_s3  ;;  %281 = vst.msk [vmem:[%s513_s8 + $0x10] sm:$0xff] %vm49_vm0, %v271_v37 }
 0x141   :  { %v156_v38 = vpop.permute.xlu0 %155 }
 0x142   :  { %167 = vst.msk [vmem:[%s514_s7] sm:$0xff] %vm49_vm0, %v156_v38 }
 0x145   :  { %v160_v39 = vpop.permute.xlu1 %159  ;;  %v158_v40 = vpop.permute.xlu0 %157 }
 0x146   :  { %169 = vst.msk [vmem:[%s514_s7 + $0x10] sm:$0xff] %vm49_vm0, %v160_v39  ;;  %168 = vst.msk [vmem:[%s514_s7 + $0x8] sm:$0xff] %vm49_vm0, %v158_v40 }
 0x149   :  { %v162_v41 = vpop.permute.xlu1 %161 }
 0x14a   :  { %170 = vst.msk [vmem:[%s514_s7 + $0x18] sm:$0xff] %vm49_vm0, %v162_v41 }

// kernel: encoder_layer_forward.5
= control target key start
LH: loop header
LB: loop body
LE: loop exit
PB: predicated region body
PF: predicated region fallthrough
CT: control target
= control target key end

     0   :  { %vm41_vm0 = vcmask 261120   ;;  %vm158_vm1 = vcmask 523264   ;;  %s551_s1 = inlined_call_operand.vmem [shape: f32[32,64], index: 1, kind: input, shape index: {}]   ;;  %s552_s0 = inlined_call_operand.vmem [shape: f32[32,32], index: 0, kind: input, shape index: {}]   ;;  %s553_s3 = inlined_call_operand.vmem [shape: f32[64,32], index: 3, kind: input, shape index: {}]   ;;  %s554_s2 = inlined_call_operand.vmem [shape: f32[1,64], index: 2, kind: input, shape index: {}]   ;;  %s555_s4 = inlined_call_operand.vmem [shape: f32[1,32], index: 4, kind: input, shape index: {}]   ;;  %s556_s5 = inlined_call_operand.vmem [shape: f32[1,32], index: 5, kind: input, shape index: {}]   ;;  %s557_s6 = inlined_call_operand.vmem [shape: f32[1,32], index: 6, kind: input, shape index: {}]   ;;  %s558_s7 = inlined_call_operand.vmem [shape: f32[32,32], index: 7, kind: output, shape index: {}]  }
   0x1   :  { %v33_v0 = vld [vmem:[%s551_s1 + $0x18] sm:$0xff]  ;;  %v32_v1 = vld [vmem:[%s551_s1 + $0x10] sm:$0xff]  ;;  %v468_v2 = vld [vmem:[%s552_s0] sm:$0xff] }
   0x2   :  { %375 = vmatprep.subr.mxu0 %v33_v0  ;;  %v31_v3 = vld [vmem:[%s551_s1 + $0x8] sm:$0xff]  ;;  %383 = vmatprep.mubr.msk.f32.mxu0 %vm41_vm0, %v468_v2  ;;  %v150_v4 = vld [vmem:[%s553_s3 + $0x38] sm:$0xff]  ;;  %v149_v5 = vld [vmem:[%s553_s3 + $0x30] sm:$0xff] }
   0x3   :  { %376 = vmatpush3.msra.mxu0 %v33_v0  ;;  %389 = vmatprep.subr.mxu1 %v150_v4  ;;  %v30_v6 = vld [vmem:[%s551_s1] sm:$0xff]  ;;  %v148_v7 = vld [vmem:[%s553_s3 + $0x28] sm:$0xff]  ;;  %v28_v10 = vld [vmem:[%s552_s0 + $0x10] sm:$0xff] }
   0x4   :  { %377 = vmatprep.subr.mxu0 %v32_v1  ;;  %390 = vmatpush3.msra.mxu1 %v150_v4  ;;  %v27_v8 = vld [vmem:[%s552_s0 + $0x8] sm:$0xff]  ;;  %v147_v9 = vld [vmem:[%s553_s3 + $0x20] sm:$0xff]  ;;  %v29_v11 = vld [vmem:[%s552_s0 + $0x18] sm:$0xff] }
   0x5   :  { %378 = vmatpush3.msra.mxu0 %v32_v1  ;;  %391 = vmatprep.subr.mxu1 %v149_v5  ;;  %v146_v12 = vld [vmem:[%s553_s3 + $0x18] sm:$0xff]  ;;  %v145_v13 = vld [vmem:[%s553_s3 + $0x10] sm:$0xff]  ;;  %v144_v14 = vld [vmem:[%s553_s3 + $0x8] sm:$0xff] }
   0x6   :  { %379 = vmatprep.subr.mxu0 %v31_v3  ;;  %392 = vmatpush3.msra.mxu1 %v149_v5  ;;  %v143_v15 = vld [vmem:[%s553_s3] sm:$0xff] }
   0x7   :  { %380 = vmatpush3.msra.mxu0 %v31_v3  ;;  %393 = vmatprep.subr.mxu1 %v148_v7  ;;  %v343_v16 = vld [vmem:[%s554_s2] ss:$0 sm:$0xff] }
   0x8   :  { %381 = vmatprep.subr.mxu0 %v30_v6  ;;  %394 = vmatpush3.msra.mxu1 %v148_v7  ;;  %v348_v30 = vld [vmem:[%s555_s4] ss:$0 sm:$0xff] }
   0x9   :  { %382 = vmatpush3.msra.mxu0 %v30_v6  ;;  %395 = vmatprep.subr.mxu1 %v147_v9 }
   0xa   :  { %384 = vmatmul.mubr.msk.f32.vlgmr.msra.gmra.mxu0 %vm41_vm0, %v27_v8  ;;  %396 = vmatpush3.msra.mxu1 %v147_v9 }
   0xb   :  { %386 = vmatprep.mubr.msk.f32.mxu0 %vm41_vm0, %v28_v10  ;;  %397 = vmatprep.subr.mxu1 %v146_v12 }
   0xc   :  { %398 = vmatpush3.msra.mxu1 %v146_v12 }
   0xd   :  { %399 = vmatprep.subr.mxu1 %v145_v13 }
   0xe   :  { %387 = vmatmul.mubr.msk.f32.gmra.mxu0 %vm41_vm0, %v29_v11  ;;  %400 = vmatpush3.msra.mxu1 %v145_v13 }
   0xf   :  { %401 = vmatprep.subr.mxu1 %v144_v14 }
  0x10   :  { %402 = vmatpush3.msra.mxu1 %v144_v14 }
  0x11   :  { %403 = vmatprep.subr.mxu1 %v143_v15 }
  0x12   :  { %404 = vmatpush3.msra.mxu1 %v143_v15  ;;  %v353_v15 = vld [vmem:[%s556_s5] ss:$0 sm:$0xff] }
  0xca   :  { %v385_v17 = vpop.f32.mrf.mxu0 }
  0xcb   :  { %v126_v18 = vadd.f32 %v385_v17, %v343_v16  ;;  %v354_v17 = vld [vmem:[%s557_s6] ss:$0 sm:$0xff] }
  0xcc   :  { %v120_v19 = vpop.f32.mrf.mxu0 }
  0xcd   :  { %v121_v20 = vadd.f32 %v343_v16, %v120_v19  ;;  %v140_v23 = vmax.f32 %v126_v18, 0.0 }
  0xce   :  { %v388_v21 = vpop.f32.mrf.mxu0 }
  0xcf   :  { %v139_v22 = vmax.f32 %v121_v20, 0.0  ;;  %v136_v24 = vadd.f32 %v388_v21, %v343_v16 }
  0xd0   :  { %v130_v25 = vpop.f32.mrf.mxu0 }
  0xd1   :  { %v131_v26 = vadd.f32 %v343_v16, %v130_v25  ;;  %405 = vmatprep.mubr.msk.f32.mxu1 %vm158_vm1, %v139_v22  ;;  %v142_v28 = vmax.f32 %v136_v24, 0.0 }
  0xd2   :  { %406 = vmatmul.mubr.msk.f32.vlgmr.msra.gmra.mxu1 %vm158_vm1, %v140_v23 }
  0xd3   :  { %v141_v27 = vmax.f32 %v131_v26, 0.0 }
  0xd5   :  { %408 = vmatprep.mubr.msk.f32.mxu1 %vm158_vm1, %v141_v27 }
  0xd6   :  { %409 = vmatmul.mubr.msk.f32.gmra.mxu1 %vm158_vm1, %v142_v28 }
 0x192   :  { %v407_v29 = vpop.f32.mrf.mxu1 }
 0x193   :  { %v243_v32 = vadd.f32 %v407_v29, %v348_v30 }
 0x194   :  { %v237_v31 = vpop.f32.mrf.mxu1 }
 0x195   :  { %v238_v33 = vadd.f32 %v348_v30, %v237_v31  ;;  %v257_v40 = vadd.f32 %v243_v32, %v27_v8 }
 0x196   :  { %v410_v34 = vpop.f32.mrf.mxu1 }
 0x197   :  { %v256_v35 = vadd.f32 %v238_v33, %v468_v2  ;;  %v253_v37 = vadd.f32 %v410_v34, %v348_v30  ;;  %v263_v43 = vsel %vm41_vm0, %v257_v40, 0.0 }
 0x198   :  { %v247_v36 = vpop.f32.mrf.mxu1 }
 0x199   :  { %v248_v38 = vadd.f32 %v348_v30, %v247_v36  ;;  %v260_v39 = vsel %vm41_vm0, %v256_v35, 0.0  ;;  %v259_v44 = vadd.f32 %v253_v37, %v29_v11 }
 0x19a   :  { %261 = vadd.xlane.f32.xlu0 %v260_v39 }
 0x19b   :  { %v258_v41 = vadd.f32 %v248_v38, %v28_v10  ;;  %v269_v45 = vsel %vm41_vm0, %v259_v44, 0.0 }
 0x19d   :  { %v266_v42 = vsel %vm41_vm0, %v258_v41, 0.0 }
 0x19e   :  { %267 = vadd.xlane.f32.xlu1 %v266_v42  ;;  %264 = vadd.xlane.f32.xlu0 %v263_v43 }
 0x1a2   :  { %270 = vadd.xlane.f32.xlu1 %v269_v45 }
 0x223   :  { %v262_v46 = vpop.xlane.xlu0 %261 }
 0x224   :  { %v273_v47 = vmul.f32 0.03125, %v262_v46 }
 0x226   :  { %v277_v48 = vsub.f32 %v256_v35, %v273_v47 }
 0x227   :  { %v268_v49 = vpop.xlane.xlu1 %267  ;;  %v265_v50 = vpop.xlane.xlu0 %264 }
 0x228   :  { %v275_v51 = vmul.f32 0.03125, %v268_v49  ;;  %v274_v52 = vmul.f32 0.03125, %v265_v50  ;;  %v281_v53 = vmul.f32 %v277_v48, %v277_v48 }
 0x22a   :  { %v279_v54 = vsub.f32 %v258_v41, %v275_v51  ;;  %v278_v55 = vsub.f32 %v257_v40, %v274_v52  ;;  %v285_v56 = vsel %vm41_vm0, %v281_v53, 0.0 }
 0x22b   :  { %v271_v57 = vpop.xlane.xlu1 %270  ;;  %286 = vadd.xlane.f32.xlu0 %v285_v56 }
 0x22c   :  { %v276_v58 = vmul.f32 0.03125, %v271_v57  ;;  %v283_v59 = vmul.f32 %v279_v54, %v279_v54  ;;  %v282_v60 = vmul.f32 %v278_v55, %v278_v55 }
 0x22e   :  { %v280_v61 = vsub.f32 %v259_v44, %v276_v58  ;;  %v291_v62 = vsel %vm41_vm0, %v283_v59, 0.0  ;;  %v288_v63 = vsel %vm41_vm0, %v282_v60, 0.0 }
 0x22f   :  { %292 = vadd.xlane.f32.xlu0 %v291_v62  ;;  %289 = vadd.xlane.f32.xlu1 %v288_v63 }
 0x230   :  { %v284_v0 = vmul.f32 %v280_v61, %v280_v61 }
 0x232   :  { %v294_v1 = vsel %vm41_vm0, %v284_v0, 0.0 }
 0x233   :  { %295 = vadd.xlane.f32.xlu1 %v294_v1 }
 0x2b4   :  { %v287_v2 = vpop.xlane.xlu0 %286 }
 0x2b5   :  { %v297_v3 = vmul.f32 0.03125, %v287_v2 }
 0x2b7   :  { %v301_v4 = vadd.f32 1e-05, %v297_v3 }
 0x2b8   :  { %v290_v5 = vpop.xlane.xlu1 %289  ;;  %v293_v6 = vpop.xlane.xlu0 %292 }
 0x2b9   :  { %411 = vrsqrt.f32 %v301_v4  ;;  %v298_v7 = vmul.f32 0.03125, %v290_v5  ;;  %v299_v8 = vmul.f32 0.03125, %v293_v6 }
 0x2bb   :  { %v302_v9 = vadd.f32 1e-05, %v298_v7  ;;  %v303_v10 = vadd.f32 1e-05, %v299_v8 }
 0x2bc   :  { %v296_v11 = vpop.xlane.xlu1 %295 }
 0x2bd   :  { %413 = vrsqrt.f32 %v302_v9  ;;  %v300_v12 = vmul.f32 0.03125, %v296_v11 }
 0x2be   :  { %415 = vrsqrt.f32 %v303_v10 }
 0x2bf   :  { %v304_v13 = vadd.f32 1e-05, %v300_v12 }
 0x2c1   :  { %417 = vrsqrt.f32 %v304_v13 }
 0x2c6   :  { %v412_v14 = vpop.eup %411 }
 0x2c7   :  { %v309_v16 = vmul.f32 %v412_v14, %v277_v48 }
 0x2c9   :  { %v320_v18 = vmul.f32 %v353_v15, %v309_v16 }
 0x2ca   :  { %v414_v19 = vpop.eup %413 }
 0x2cb   :  { %v416_v20 = vpop.eup %415  ;;  %v331_v21 = vadd.f32 %v354_v17, %v320_v18  ;;  %v310_v22 = vmul.f32 %v414_v19, %v278_v55 }
 0x2cc   :  { %v311_v23 = vmul.f32 %v416_v20, %v279_v54 }
 0x2cd   :  { %335 = vst.msk [vmem:[%s558_s7] sm:$0xff] %vm41_vm0, %v331_v21  ;;  %v321_v24 = vmul.f32 %v353_v15, %v310_v22 }
 0x2ce   :  { %v418_v25 = vpop.eup %417  ;;  %v322_v26 = vmul.f32 %v353_v15, %v311_v23 }
 0x2cf   :  { %v332_v27 = vadd.f32 %v354_v17, %v321_v24  ;;  %v312_v28 = vmul.f32 %v418_v25, %v280_v61 }
 0x2d0   :  { %v333_v29 = vadd.f32 %v354_v17, %v322_v26 }
 0x2d1   :  { %336 = vst.msk [vmem:[%s558_s7 + $0x8] sm:$0xff] %vm41_vm0, %v332_v27  ;;  %v323_v30 = vmul.f32 %v353_v15, %v312_v28 }
 0x2d2   :  { %337 = vst.msk [vmem:[%s558_s7 + $0x10] sm:$0xff] %vm41_vm0, %v333_v29 }
 0x2d3   :  { %v334_v31 = vadd.f32 %v354_v17, %v323_v30 }
 0x2d5   :  { %338 = vst.msk [vmem:[%s558_s7 + $0x18] sm:$0xff] %vm41_vm0, %v334_v31 }

// kernel: encoder_layer_forward.4
= control target key start
LH: loop header
LB: loop body
LE: loop exit
PB: predicated region body
PF: predicated region fallthrough
CT: control target
= control target key end

     0   :  { %s1895_s30 = smov 0   ;;  %s1897_s10 = smov 0   ;;  %s2096_s0 = inlined_call_operand.vmem [shape: f32[2,16,32], index: 0, kind: input, shape index: {}]   ;;  %s2097_s1 = inlined_call_operand.vmem [shape: f32[2,16,32], index: 1, kind: input, shape index: {}]   ;;  %s2098_s2 = inlined_call_operand.vmem [shape: f32[2,16,32], index: 2, kind: input, shape index: {}]   ;;  %s2099_s3 = inlined_call_operand.vmem [shape: f32[2,1,16], index: 3, kind: input, shape index: {}]   ;;  %s2100_s4 = inlined_call_operand.vmem [shape: f32[2,16,32], index: 4, kind: input, shape index: {}]   ;;  %s2101_s5 = inlined_call_operand.vmem [shape: f32[32,32], index: 5, kind: input, shape index: {}]   ;;  %s2102_s6 = inlined_call_operand.vmem [shape: f32[1,32], index: 6, kind: input, shape index: {}]   ;;  %s2103_s7 = inlined_call_operand.vmem [shape: f32[1,32], index: 7, kind: input, shape index: {}]   ;;  %s2104_s8 = inlined_call_operand.vmem [shape: f32[1,32], index: 8, kind: input, shape index: {}]   ;;  %s2105_s9 = inlined_call_operand.vmem [shape: f32[2,16,32], index: 9, kind: output, shape index: {}]  }
   0x1   :  { %s1899_s11 = smov 0  }
   0x2 LB: > { %s31_s12 = sadd.s32 1, %s1833_s10  ;;  %p1596_p0 = scmp.ge.s32.totalorder %s1837_s11, 1  ;;  %s1837_s11 = sphi %s1899_s11, %s19_s11   ;;  %s1833_s10 = sphi %s1897_s10, %s2107_s10   ;;  %s1829_s30 = sphi %s1895_s30, %s2106_s30  }
   0x3   : > { %p33_p1 = scmp.ge.s32.totalorder %s31_s12, 2  ;;  %p353_p2 = scmp.lt.s32.totalorder %s1837_s11, 3 }
   0x5   : > { %s2109_s12 = smov (%p33_p1, %s31_s12), 0  ;;  %p354_p3 = pnand %p1596_p0, %p353_p2 }
   0x6   : > { %p420_p4 = scmp.lt.s32.totalorder (!%p354_p3), %s1829_s30, 1  ;;  %s1839_s20 = smov (!%p354_p3), 120  }
   0x7   : > { %357 = sbr.rel (%p354_p3) target bundleno = 2426 (0x97a), region = 56  ;;  %s1840_s21 = smov (!%p354_p3), 112  }
   0x8   : > { %s1841_s28 = smov (!%p354_p3), 104   ;;  %s1842_s29 = smov (!%p354_p3), 8  }
   0x9   : > { %s1844_s22 = smov (!%p354_p3), 24  }
   0xc   : > { %s2111_s30 = smov (!%p420_p4, %s1829_s30), 1  ;;  %vm477_vm0 = vcmask 64512   ;;  %vm565_vm1 = vcmask 130048   ;;  %vm881_vm2 = vcmask 130112   ;;  %vm1092_vm3 = vcmask 195712  }
   0xd   : > { %s1913_s13 = sshll.u32 %s2111_s30, 4  ;;  %s441_s24 = scalar_lea.vmem %s2099_s3, %s2111_s30  ;;  %vm1303_vm4 = vcmask 261312   ;;  %vm1312_vm5 = vcmask 261120  }
   0xe   : > { %s433_s16 = scalar_lea.vmem %s2097_s1, %s1913_s13  ;;  %s427_s19 = scalar_lea.vmem %s2096_s0, %s1913_s13  ;;  %v1952_v7 = vld [vmem:[%s441_s24] ss:$0 sm:$0xff] }
   0xf   : > { %v1919_v0 = vld [vmem:[%s433_s16 + $0x8] sm:$0xff]  ;;  %v1921_v1 = vld [vmem:[%s433_s16] sm:$0xff]  ;;  %s438_s27 = scalar_lea.vmem %s2098_s2, %s1913_s13  ;;  %s1843_s30 = smov 16  }
  0x10   : > { %1682 = vmatprep.subr.msk.mxu0 %vm477_vm0, %v1919_v0  ;;  %v462_v2 = vld [vmem:[%s427_s19] sm:$0xff]  ;;  %v463_v4 = vld [vmem:[%s427_s19 + $0x8] sm:$0xff]  ;;  %675 = vrot.lane.b32.xlu1 %v1921_v1, %s1839_s20  ;;  %s450_s25 = scalar_lea.vmem %s2100_s4, %s1913_s13  ;;  %s460_s17 = scalar_lea.vmem %s2105_s9, %s1913_s13 }
  0x11   : > { %1683 = vmatpush3.xpose.msk.msra.mxu0 %vm477_vm0, %v1919_v0  ;;  %v1931_v3 = vmul.f32 0.35355338, %v462_v2  ;;  %v1937_v5 = vmul.f32 0.35355338, %v463_v4  ;;  %v1972_v25 = vld [vmem:[%s438_s27 + $0x8] sm:$0xff]  ;;  %v1974_v26 = vld [vmem:[%s438_s27] sm:$0xff] }
  0x12   : > { %1684 = vmatprep.subr.msk.mxu0 %vm477_vm0, %v1921_v1  ;;  %1689 = vmatprep.subr.mxu1 %v1972_v25 }
  0x13   : > { %1686 = vmatprep.mubr.msk.f32.mxu0 %vm477_vm0, %v1931_v3  ;;  %1690 = vmatpush3.msra.mxu1 %v1972_v25 }
  0x14   : > { %890 = vrot.lane.b32.xlu1 %v1919_v0, %s1840_s21  ;;  %1691 = vmatprep.subr.mxu1 %v1974_v26 }
  0x15   : > { %1685 = vmatpush3.xpose.msk.msra.mxu0 %vm477_vm0, %v1921_v1  ;;  %1692 = vmatpush3.msra.mxu1 %v1974_v26 }
  0x18   : > { %1687 = vmatmul.mubr.msk.f32.vlgmr.msra.gmra.mxu0 %vm477_vm0, %v1937_v5  ;;  %671 = vrot.lane.b32.xlu1 %v1931_v3, %s1839_s20 }
  0x82   : > { %v676_v13 = vpop.permute.xlu1 %675 }
  0x86   : > { %v891_v14 = vpop.permute.xlu1 %890 }
  0x87   : > { %1710 = vmatprep.subr.msk.mxu0 %vm477_vm0, %v891_v14 }
  0x88   : > { %1711 = vmatpush3.xpose.msk.msra.mxu0 %vm477_vm0, %v891_v14 }
  0x8a   : > { %v672_v30 = vpop.permute.xlu1 %671 }
  0xd8   : > { %v1688_v6 = vpop.f32.mrf.mxu0 }
  0xd9   : > { %v562_v10 = vadd.f32 %v1688_v6, %v1952_v7 }
  0xda   : > { %v556_v8 = vpop.f32.mrf.mxu0 }
  0xdb   : > { %v557_v9 = vadd.f32 %v1952_v7, %v556_v8  ;;  %v569_v12 = vsel %vm565_vm1, %v562_v10, -inf }
  0xdd   : > { %v566_v11 = vsel %vm565_vm1, %v557_v9, -inf }
  0xde   : > { %567 = vmax.xlane.f32.xlu0 %v566_v11 }
  0xe2   : > { %570 = vmax.xlane.f32.xlu0 %v569_v12 }
  0xf8   : > { %677 = vrot.lane.b32.xlu0 %v1919_v0, %s1839_s20 }
  0xfc   : > { %673 = vrot.lane.b32.xlu0 %v1937_v5, %s1839_s20 }
 0x100   : > { %884 = vrot.lane.b32.xlu0 %v1931_v3, %s1840_s21 }
 0x167   : > { %v568_v15 = vpop.xlane.xlu0 %567 }
 0x168   : > { %v572_v16 = vsub.f32 %v557_v9, %v568_v15 }
 0x16a   : > { %v574_v19 = vmul.f32 1.442695, %v572_v16 }
 0x16b   : > { %v571_v17 = vpop.xlane.xlu0 %570 }
 0x16c   : > { %v573_v18 = vsub.f32 %v562_v10, %v571_v17 }
 0x16e   : > { %v576_v20 = vmul.f32 1.442695, %v573_v18 }
 0x16f   : > { %v678_v27 = vpop.permute.xlu0 %677 }
 0x170   : > { %1779 = vpow2.f32 %v576_v20  ;;  %1696 = vmatprep.subr.msk.mxu1 %vm477_vm0, %v678_v27 }
 0x171   : > { %1781 = vpow2.f32 %v574_v19 }
 0x173   : > { %v674_v28 = vpop.permute.xlu0 %673 }
 0x177   : > { %v885_v29 = vpop.permute.xlu0 %884 }
 0x178   : > { %1714 = vmatprep.mubr.msk.f32.mxu0 %vm477_vm0, %v885_v29 }
 0x17d   : > { %v1780_v21 = vpop.eup %1779 }
 0x17e   : > { %v581_v22 = vsel %vm565_vm1, %v1780_v21, 0.0  ;;  %v1782_v23 = vpop.eup %1781 }
 0x17f   : > { %582 = vadd.xlane.f32.xlu1 %v581_v22  ;;  %v578_v24 = vsel %vm565_vm1, %v1782_v23, 0.0 }
 0x183   : > { %579 = vadd.xlane.f32.xlu1 %v578_v24 }
 0x194   : > { %888 = vrot.lane.b32.xlu1 %v1921_v1, %s1840_s21 }
 0x198   : > { %886 = vrot.lane.b32.xlu1 %v1937_v5, %s1840_s21 }
 0x208   : > { %v583_v31 = vpop.xlane.xlu1 %582 }
 0x209   : > { %1783 = vrcp.f32 %v583_v31 }
 0x20c   : > { %v580_v32 = vpop.xlane.xlu1 %579 }
 0x20d   : > { %1785 = vrcp.f32 %v580_v32 }
 0x210   : > { %v889_v33 = vpop.permute.xlu1 %888 }
 0x211   : > { %1712 = vmatprep.subr.msk.mxu0 %vm477_vm0, %v889_v33 }
 0x212   : > { %1713 = vmatpush3.xpose.msk.msra.mxu0 %vm477_vm0, %v889_v33 }
 0x214   : > { %v887_v34 = vpop.permute.xlu1 %886 }
 0x215   : > { %1715 = vmatmul.mubr.msk.f32.vlgmr.msra.gmra.mxu0 %vm477_vm0, %v887_v34 }
 0x216   : > { %v1784_v35 = vpop.eup %1783 }
 0x217   : > { %v587_v38 = vmul.f32 %v1784_v35, %v1780_v21 }
 0x21a   : > { %v1786_v36 = vpop.eup %1785 }
 0x21b   : > { %v585_v37 = vmul.f32 %v1786_v36, %v1782_v23 }
 0x21d   : > { %1693 = vmatprep.mubr.msk.f32.mxu1 %vm565_vm1, %v585_v37 }
 0x21e   : > { %1694 = vmatmul.mubr.msk.f32.vlgmr.msra.gmra.mxu1 %vm565_vm1, %v587_v38 }
 0x21f   : > { %1697 = vmatpush3.xpose.msk.msra.mxu1 %vm477_vm0, %v678_v27  ;;  %1700 = vmatprep.mubr.msk.f32.mxu1 %vm477_vm0, %v672_v30 }
 0x220   : > { %1698 = vmatprep.subr.msk.mxu1 %vm477_vm0, %v676_v13 }
 0x223   : > { %1699 = vmatpush3.xpose.msk.msra.mxu1 %vm477_vm0, %v676_v13 }
 0x226   : > { %1701 = vmatmul.mubr.msk.f32.vlgmr.msra.gmra.mxu1 %vm477_vm0, %v674_v28 }
 0x2d5   : > { %v1716_v41 = vpop.f32.mrf.mxu0 }
 0x2d6   : > { %v972_v50 = vadd.f32 %v1716_v41, %v1952_v7 }
 0x2d7   : > { %v966_v45 = vpop.f32.mrf.mxu0 }
 0x2d8   : > { %v967_v48 = vadd.f32 %v1952_v7, %v966_v45  ;;  %v978_v52 = vsel %vm565_vm1, %v972_v50, -inf }
 0x2da   : > { %v975_v51 = vsel %vm565_vm1, %v967_v48, -inf }
 0x2de   : > { %v1695_v39 = vpop.f32.mrf.mxu1 }
 0x2df   : > { %670 = vst.msk [vmem:[#allocation2 + $0x8] sm:$0xff] %vm477_vm0, %v1695_v39 }
 0x2e0   : > { %v660_v40 = vpop.f32.mrf.mxu1 }
 0x2e1   : > { %669 = vst.msk [vmem:[#allocation2] sm:$0xff] %vm477_vm0, %v660_v40 }
 0x2e6   : > { %v1702_v42 = vpop.f32.mrf.mxu1 }
 0x2e7   : > { %v759_v43 = vadd.f32 %v1702_v42, %v1952_v7 }
 0x2e8   : > { %v753_v44 = vpop.f32.mrf.mxu1 }
 0x2e9   : > { %v754_v46 = vadd.f32 %v1952_v7, %v753_v44  ;;  %v765_v47 = vsel %vm565_vm1, %v759_v43, -inf }
 0x2ea   : > { %766 = vmax.xlane.f32.xlu1 %v765_v47 }
 0x2eb   : > { %v762_v49 = vsel %vm565_vm1, %v754_v46, -inf }
 0x2ec   : > { %763 = vmax.xlane.f32.xlu0 %v762_v49 }
 0x2f0   : > { %976 = vmax.xlane.f32.xlu0 %v975_v51 }
 0x2f4   : > { %979 = vmax.xlane.f32.xlu0 %v978_v52 }
 0x373   : > { %v767_v55 = vpop.xlane.xlu1 %766 }
 0x374   : > { %v769_v58 = vsub.f32 %v759_v43, %v767_v55 }
 0x375   : > { %v764_v53 = vpop.xlane.xlu0 %763 }
 0x376   : > { %v768_v54 = vsub.f32 %v754_v46, %v764_v53  ;;  %v772_v63 = vmul.f32 1.442695, %v769_v58 }
 0x378   : > { %v770_v59 = vmul.f32 1.442695, %v768_v54 }
 0x379   : > { %v977_v56 = vpop.xlane.xlu0 %976 }
 0x37a   : > { %v981_v57 = vsub.f32 %v967_v48, %v977_v56 }
 0x37c   : > { %v983_v60 = vmul.f32 1.442695, %v981_v57 }
 0x37d   : > { %v980_v61 = vpop.xlane.xlu0 %979 }
 0x37e   : > { %1787 = vpow2.f32 %v983_v60  ;;  %v982_v62 = vsub.f32 %v972_v50, %v980_v61 }
 0x37f   : > { %1789 = vpow2.f32 %v770_v59 }
 0x380   : > { %v985_v2 = vmul.f32 1.442695, %v982_v62  ;;  %v1310_v62 = vld [vmem:[%s2101_s5 + $0x10] sm:$0xff] }
 0x382   : > { %1791 = vpow2.f32 %v985_v2  ;;  %v1308_v2 = vld [vmem:[%s2101_s5] sm:$0xff] }
 0x383   : > { %1793 = vpow2.f32 %v772_v63  ;;  %v1309_v63 = vld [vmem:[%s2101_s5 + $0x8] sm:$0xff] }
 0x38b   : > { %v1788_v4 = vpop.eup %1787 }
 0x38c   : > { %v987_v6 = vsel %vm565_vm1, %v1788_v4, 0.0  ;;  %v1790_v8 = vpop.eup %1789 }
 0x38d   : > { %988 = vadd.xlane.f32.xlu0 %v987_v6  ;;  %v774_v10 = vsel %vm565_vm1, %v1790_v8, 0.0 }
 0x38f   : > { %v1792_v9 = vpop.eup %1791 }
 0x390   : > { %v990_v11 = vsel %vm565_vm1, %v1792_v9, 0.0  ;;  %v1794_v12 = vpop.eup %1793 }
 0x391   : > { %775 = vadd.xlane.f32.xlu0 %v774_v10  ;;  %991 = vadd.xlane.f32.xlu1 %v990_v11  ;;  %v777_v13 = vsel %vm565_vm1, %v1794_v12, 0.0 }
 0x395   : > { %778 = vadd.xlane.f32.xlu1 %v777_v13 }
 0x3a6   : > { %786 = vrot.lane.b32.xlu1 %v1974_v26, %s1839_s20 }
 0x3a7   : > { %788 = vrot.lane.b32.xlu0 %v1972_v25, %s1839_s20 }
 0x3aa   : > { %999 = vrot.lane.b32.xlu1 %v1972_v25, %s1840_s21 }
 0x3ab   : > { %1101 = vrot.lane.b32.xlu0 %v1919_v0, %s1841_s28 }
 0x3ae   : > { %997 = vrot.lane.b32.xlu1 %v1974_v26, %s1840_s21 }
 0x3af   : > { %1095 = vrot.lane.b32.xlu0 %v1931_v3, %s1841_s28 }
 0x3b2   : > { %1099 = vrot.lane.b32.xlu1 %v1921_v1, %s1841_s28 }
 0x3b6   : > { %1097 = vrot.lane.b32.xlu1 %v1937_v5, %s1841_s28 }
 0x416   : > { %v989_v14 = vpop.xlane.xlu0 %988 }
 0x41a   : > { %v992_v15 = vpop.xlane.xlu1 %991  ;;  %v776_v16 = vpop.xlane.xlu0 %775 }
 0x41b   : > { %1795 = vrcp.f32 %v776_v16 }
 0x41c   : > { %1797 = vrcp.f32 %v989_v14  ;;  %v1404_v14 = vld [vmem:[%s450_s25 + $0x8] sm:$0xff] }
 0x41e   : > { %v779_v17 = vpop.xlane.xlu1 %778  ;;  %v789_v18 = vpop.permute.xlu0 %788 }
 0x41f   : > { %1799 = vrcp.f32 %v779_v17  ;;  %1703 = vmatprep.subr.mxu1 %v789_v18  ;;  %v1403_v17 = vld [vmem:[%s450_s25] sm:$0xff] }
 0x420   : > { %1704 = vmatpush3.msra.mxu1 %v789_v18  ;;  %1801 = vrcp.f32 %v992_v15 }
 0x422   : > { %v787_v0 = vpop.permute.xlu1 %786  ;;  %v1102_v22 = vpop.permute.xlu0 %1101 }
 0x423   : > { %1705 = vmatprep.subr.mxu1 %v787_v0 }
 0x424   : > { %1706 = vmatpush3.msra.mxu1 %v787_v0 }
 0x426   : > { %v1000_v3 = vpop.permute.xlu1 %999  ;;  %v1096_v29 = vpop.permute.xlu0 %1095 }
 0x427   : > { %1717 = vmatprep.subr.mxu1 %v1000_v3 }
 0x428   : > { %v1796_v1 = vpop.eup %1795 }
 0x429   : > { %v781_v19 = vmul.f32 %v1796_v1, %v1790_v8  ;;  %v1798_v20 = vpop.eup %1797 }
 0x42a   : > { %v998_v24 = vpop.permute.xlu1 %997  ;;  %v994_v27 = vmul.f32 %v1798_v20, %v1788_v4 }
 0x42b   : > { %1707 = vmatprep.mubr.msk.f32.mxu1 %vm565_vm1, %v781_v19 }
 0x42c   : > { %v1800_v5 = vpop.eup %1799 }
 0x42d   : > { %v783_v21 = vmul.f32 %v1800_v5, %v1794_v12  ;;  %v1802_v23 = vpop.eup %1801  ;;  %v1634_v12 = vld [vmem:[%s2102_s6] ss:$0 sm:$0xff] }
 0x42e   : > { %v996_v28 = vmul.f32 %v1802_v23, %v1792_v9  ;;  %v1100_v30 = vpop.permute.xlu1 %1099 }
 0x42f   : > { %1708 = vmatmul.mubr.msk.f32.vlgmr.msra.gmra.mxu1 %vm565_vm1, %v783_v21 }
 0x430   : > { %1718 = vmatpush3.msra.mxu1 %v1000_v3  ;;  %1721 = vmatprep.mubr.msk.f32.mxu1 %vm565_vm1, %v994_v27 }
 0x431   : > { %1719 = vmatprep.subr.mxu1 %v998_v24 }
 0x432   : > { %1720 = vmatpush3.msra.mxu1 %v998_v24  ;;  %v1098_v31 = vpop.permute.xlu1 %1097 }
 0x433   : > { %1724 = vmatprep.subr.msk.mxu1 %vm477_vm0, %v1102_v22  ;;  %1722 = vmatmul.mubr.msk.f32.vlgmr.msra.gmra.mxu1 %vm565_vm1, %v996_v28 }
 0x434   : > { %1725 = vmatpush3.xpose.msk.msra.mxu1 %vm477_vm0, %v1102_v22  ;;  %1728 = vmatprep.mubr.msk.f32.mxu1 %vm477_vm0, %v1096_v29 }
 0x435   : > { %1726 = vmatprep.subr.msk.mxu1 %vm477_vm0, %v1100_v30 }
 0x438   : > { %1727 = vmatpush3.xpose.msk.msra.mxu1 %vm477_vm0, %v1100_v30 }
 0x43b   : > { %1729 = vmatmul.mubr.msk.f32.vlgmr.msra.gmra.mxu1 %vm477_vm0, %v1098_v31 }
 0x4ef   : > { %v1709_v32 = vpop.f32.mrf.mxu1 }
 0x4f1   : > { %v864_v33 = vpop.f32.mrf.mxu1 }
 0x4f3   : > { %v1723_v34 = vpop.f32.mrf.mxu1 }
 0x4f5   : > { %v1075_v35 = vpop.f32.mrf.mxu1 }
 0x4fb   : > { %v1730_v36 = vpop.f32.mrf.mxu1 }
 0x4fc   : > { %v1183_v37 = vadd.f32 %v1730_v36, %v1952_v7 }
 0x4fd   : > { %v1177_v38 = vpop.f32.mrf.mxu1 }
 0x4fe   : > { %v1178_v39 = vadd.f32 %v1952_v7, %v1177_v38  ;;  %v1189_v40 = vsel %vm565_vm1, %v1183_v37, -inf  ;;  %v1635_v38 = vld [vmem:[%s2103_s7] ss:$0 sm:$0xff] }
 0x4ff   : > { %1190 = vmax.xlane.f32.xlu1 %v1189_v40  ;;  %v1636_v40 = vld [vmem:[%s2104_s8] ss:$0 sm:$0xff] }
 0x500   : > { %v1186_v41 = vsel %vm565_vm1, %v1178_v39, -inf }
 0x501   : > { %1187 = vmax.xlane.f32.xlu0 %v1186_v41 }
 0x510   : > { %1208 = vrot.lane.b32.xlu1 %v1974_v26, %s1841_s28 }
 0x514   : > { %875 = vrot.lane.b32.xlu1 %v864_v33, %s1842_s29 }
 0x518   : > { %877 = vrot.lane.b32.xlu1 %v1709_v32, %s1842_s29 }
 0x51c   : > { %1088 = vrot.lane.b32.xlu1 %v1723_v34, %s1843_s30 }
 0x588   : > { %v1191_v42 = vpop.xlane.xlu1 %1190 }
 0x589   : > { %v1193_v43 = vsub.f32 %v1183_v37, %v1191_v42 }
 0x58a   : > { %v1188_v44 = vpop.xlane.xlu0 %1187 }
 0x58b   : > { %v1196_v45 = vmul.f32 1.442695, %v1193_v43  ;;  %v1192_v46 = vsub.f32 %v1178_v39, %v1188_v44 }
 0x58c   : > { %v1209_v7 = vpop.permute.xlu1 %1208 }
 0x58d   : > { %1803 = vpow2.f32 %v1196_v45  ;;  %v1194_v47 = vmul.f32 1.442695, %v1192_v46 }
 0x58f   : > { %1805 = vpow2.f32 %v1194_v47 }
 0x590   : > { %v876_v48 = vpop.permute.xlu1 %875 }
 0x591   : > { %882 = vst.msk [vmem:[#allocation2] sm:$0xff] %vm881_vm2, %v876_v48 }
 0x594   : > { %v878_v49 = vpop.permute.xlu1 %877 }
 0x595   : > { %883 = vst.msk [vmem:[#allocation2 + $0x8] sm:$0xff] %vm881_vm2, %v878_v49 }
 0x598   : > { %v1089_v26 = vpop.permute.xlu1 %1088 }
 0x599   : > { %1094 = vst.msk [vmem:[#allocation2 + $0x8] sm:$0xff] %vm1092_vm3, %v1089_v26 }
 0x59a   : > { %v1804_v50 = vpop.eup %1803 }
 0x59b   : > { %v1201_v51 = vsel %vm565_vm1, %v1804_v50, 0.0 }
 0x59c   : > { %v1806_v52 = vpop.eup %1805  ;;  %1202 = vadd.xlane.f32.xlu0 %v1201_v51 }
 0x59d   : > { %v1198_v53 = vsel %vm565_vm1, %v1806_v52, 0.0 }
 0x5a0   : > { %1199 = vadd.xlane.f32.xlu0 %v1198_v53 }
 0x5b6   : > { %1210 = vrot.lane.b32.xlu0 %v1972_v25, %s1841_s28  ;;  %v1311_v25 = vld [vmem:[%s2101_s5 + $0x18] sm:$0xff] }
 0x5ba   : > { %1086 = vrot.lane.b32.xlu0 %v1075_v35, %s1843_s30 }
 0x625   : > { %v1203_v54 = vpop.xlane.xlu0 %1202 }
 0x626   : > { %1807 = vrcp.f32 %v1203_v54 }
 0x629   : > { %v1200_v55 = vpop.xlane.xlu0 %1199 }
 0x62a   : > { %1809 = vrcp.f32 %v1200_v55 }
 0x62d   : > { %v1211_v56 = vpop.permute.xlu0 %1210 }
 0x62e   : > { %1731 = vmatprep.subr.mxu0 %v1211_v56 }
 0x62f   : > { %1732 = vmatpush3.msra.mxu0 %v1211_v56 }
 0x630   : > { %1733 = vmatprep.subr.mxu0 %v1209_v7 }
 0x631   : > { %v1087_v57 = vpop.permute.xlu0 %1086  ;;  %1734 = vmatpush3.msra.mxu0 %v1209_v7 }
 0x632   : > { %1093 = vst.msk [vmem:[#allocation2] sm:$0xff] %vm1092_vm3, %v1087_v57  ;;  %1738 = vmatprep.subr.mxu0 %v1311_v25 }
 0x633   : > { %v1808_v58 = vpop.eup %1807 }
 0x634   : > { %v1207_v61 = vmul.f32 %v1808_v58, %v1804_v50 }
 0x637   : > { %v1810_v59 = vpop.eup %1809 }
 0x638   : > { %v1205_v60 = vmul.f32 %v1810_v59, %v1806_v52 }
 0x63a   : > { %1735 = vmatprep.mubr.msk.f32.mxu0 %vm565_vm1, %v1205_v60 }
 0x63b   : > { %1736 = vmatmul.mubr.msk.f32.vlgmr.msra.gmra.mxu0 %vm565_vm1, %v1207_v61 }
 0x63c   : > { %1739 = vmatpush3.msra.mxu0 %v1311_v25 }
 0x63d   : > { %1740 = vmatprep.subr.mxu0 %v1310_v62 }
 0x63e   : > { %1741 = vmatpush3.msra.mxu0 %v1310_v62 }
 0x63f   : > { %1742 = vmatprep.subr.mxu0 %v1309_v63 }
 0x640   : > { %1743 = vmatpush3.msra.mxu0 %v1309_v63 }
 0x641   : > { %1744 = vmatprep.subr.mxu0 %v1308_v2 }
 0x642   : > { %1745 = vmatpush3.msra.mxu0 %v1308_v2 }
 0x6fb   : > { %v1737_v4 = vpop.f32.mrf.mxu0 }
 0x6fc   : > { %1299 = vrot.lane.b32.xlu1 %v1737_v4, %s1844_s22 }
 0x6fd   : > { %v1286_v6 = vpop.f32.mrf.mxu0 }
 0x6fe   : > { %1297 = vrot.lane.b32.xlu0 %v1286_v6, %s1844_s22 }
 0x76e   : > { %v1300_v8 = vpop.permute.xlu1 %1299 }
 0x76f   : > { %1305 = vst.msk [vmem:[#allocation2 + $0x8] sm:$0xff] %vm1303_vm4, %v1300_v8 }
 0x770   : > { %v1298_v9 = vpop.permute.xlu0 %1297 }
 0x771   : > { %1304 = vst.msk [vmem:[#allocation2] sm:$0xff] %vm1303_vm4, %v1298_v9 }
 0x776   : > { %v1307_v11 = vld [vmem:[#allocation2 + $0x8] sm:$0xff] }
 0x778   : > { %v1306_v10 = vld [vmem:[#allocation2] sm:$0xff] }
 0x779   : > { %1746 = vmatprep.mubr.msk.f32.mxu0 %vm1312_vm5, %v1306_v10 }
 0x77a   : > { %1747 = vmatmul.mubr.msk.f32.vlgmr.msra.gmra.mxu0 %vm1312_vm5, %v1307_v11 }
 0x83a   : > { %v1748_v13 = vpop.f32.mrf.mxu0 }
 0x83b   : > { %v1402_v15 = vadd.f32 %v1748_v13, %v1634_v12 }
 0x83c   : > { %v1385_v16 = vpop.f32.mrf.mxu0 }
 0x83d   : > { %v1401_v18 = vadd.f32 %v1634_v12, %v1385_v16  ;;  %v1406_v0 = vadd.f32 %v1404_v14, %v1402_v15 }
 0x83f   : > { %v1410_v3 = vsel %vm1312_vm5, %v1406_v0, 0.0  ;;  %v1405_v1 = vadd.f32 %v1403_v17, %v1401_v18 }
 0x840   : > { %1411 = vadd.xlane.f32.xlu1 %v1410_v3 }
 0x841   : > { %v1407_v19 = vsel %vm1312_vm5, %v1405_v1, 0.0 }
 0x842   : > { %1408 = vadd.xlane.f32.xlu0 %v1407_v19 }
 0x8c9   : > { %v1412_v20 = vpop.xlane.xlu1 %1411 }
 0x8ca   : > { %v1415_v5 = vmul.f32 0.03125, %v1412_v20 }
 0x8cb   : > { %v1409_v21 = vpop.xlane.xlu0 %1408 }
 0x8cc   : > { %v1414_v22 = vmul.f32 0.03125, %v1409_v21  ;;  %v1417_v23 = vsub.f32 %v1406_v0, %v1415_v5 }
 0x8ce   : > { %v1416_v24 = vsub.f32 %v1405_v1, %v1414_v22  ;;  %v1419_v29 = vmul.f32 %v1417_v23, %v1417_v23 }
 0x8d0   : > { %v1418_v27 = vmul.f32 %v1416_v24, %v1416_v24  ;;  %v1423_v30 = vsel %vm1312_vm5, %v1419_v29, 0.0 }
 0x8d2   : > { %v1420_v28 = vsel %vm1312_vm5, %v1418_v27, 0.0 }
 0x8d3   : > { %1421 = vadd.xlane.f32.xlu0 %v1420_v28 }
 0x8d7   : > { %1424 = vadd.xlane.f32.xlu0 %v1423_v30 }
 0x95c   : > { %v1422_v31 = vpop.xlane.xlu0 %1421 }
 0x95d   : > { %v1426_v32 = vmul.f32 0.03125, %v1422_v31 }
 0x95f   : > { %v1428_v33 = vadd.f32 1e-05, %v1426_v32 }
 0x960   : > { %v1425_v34 = vpop.xlane.xlu0 %1424 }
 0x961   : > { %1811 = vrsqrt.f32 %v1428_v33  ;;  %v1427_v35 = vmul.f32 0.03125, %v1425_v34 }
 0x963   : > { %v1429_v36 = vadd.f32 1e-05, %v1427_v35 }
 0x965   : > { %1813 = vrsqrt.f32 %v1429_v36 }
 0x96e   : > { %v1812_v37 = vpop.eup %1811 }
 0x96f   : > { %v1432_v39 = vmul.f32 %v1812_v37, %v1416_v24 }
 0x971   : > { %v1441_v41 = vmul.f32 %v1635_v38, %v1432_v39 }
 0x972   : > { %v1814_v42 = vpop.eup %1813 }
 0x973   : > { %v1450_v43 = vadd.f32 %v1636_v40, %v1441_v41  ;;  %v1433_v44 = vmul.f32 %v1814_v42, %v1417_v23 }
 0x975   : > { %1452 = vst.msk [vmem:[%s460_s17] sm:$0xff] %vm1312_vm5, %v1450_v43  ;;  %v1442_v45 = vmul.f32 %v1635_v38, %v1433_v44 }
 0x977   : > { %v1451_v46 = vadd.f32 %v1636_v40, %v1442_v45 }
 0x979   : > { %1453 = vst.msk [vmem:[%s460_s17 + $0x8] sm:$0xff] %vm1312_vm5, %v1451_v46 }
 0x97a PF: > { %s19_s11 = sadd.s32 1, %s1837_s11   ;;  %s2106_s30 = smov %s1833_s10 }
 0x97b   : > { %p16_p5 = scmp.ge.s32.totalorder %s19_s11, 4   ;;  %s2107_s10 = smov %s2109_s12 }
 0x97d   :  { %18 = sbr.rel (!%p16_p5) target bundleno = 2 (0x2), region = 98 }

</bundles_post_ra>
